<compile_context>
chip_gen: v5e
topology: v5e:2x2
jax: 0.10.0
libtpu: 0.0.40
codegen_flags: <defaults>
</compile_context>

<pallas_src>
import jax
import jax.numpy as jnp
from jax import lax
from jax.experimental import pallas as pl
from jax.experimental.pallas import tpu as pltpu


# --------------------------- kernel 1: conv stack ----------------------------

def _conv_pool_kernel(x_ref, w1_ref, b1_ref, w2_ref, b2_ref, o_ref, y1_ref):
    """Per-image fused conv1+ReLU -> conv2+bias -> 2x2 max-pool.

    x_ref : [28, 28]     f32   input image
    w1_ref: [32, 9]      f32   conv1 weight, [oc, kh*3+kw]
    b1_ref: [32, 1]      f32
    w2_ref: [9, 64, 32]  bf16  conv2 weight, [kh*3+kw, oc, ic]
    b2_ref: [64, 1]      f32
    o_ref : [12, 64, 12] bf16  pooled output, (h, c, w) layout
    y1_ref: [26, 32, 26] bf16  VMEM scratch: conv1 output, (h, c, w) layout
    """

    # ---- conv1 + ReLU: one output row per iteration (VPU outer products,
    #      f32 accumulation / epilogue; IC=1 so the MXU is not useful here). --
    def conv1_row(i, carry):
        acc = jnp.zeros((32, 26), jnp.float32)
        for kh in range(3):
            x_row = x_ref[pl.ds(i + kh, 1), :]                   # [1, 28]
            for kw in range(3):
                k = kh * 3 + kw
                w_col = w1_ref[:, k:k + 1]                       # [32, 1]
                acc = acc + w_col * x_row[:, kw:kw + 26]         # [32, 26]
        acc = jnp.maximum(acc + b1_ref[...], 0.0)                # bias + ReLU, f32
        y1_ref[i] = acc.astype(jnp.bfloat16)                     # bf16 MXU operand
        return carry

    lax.fori_loop(0, 26, conv1_row, 0)

    # 0/1 selection matrices for the width half of the 2x2 max pool (picks the
    # even / odd columns of a 24-wide row as a tiny matmul; avoids strided
    # value slices).  Built once, hoisted out of the row loop.
    rr = lax.broadcasted_iota(jnp.int32, (24, 12), 0)
    cc = lax.broadcasted_iota(jnp.int32, (24, 12), 1)
    sel_even = (rr == 2 * cc).astype(jnp.float32)
    sel_odd = (rr == 2 * cc + 1).astype(jnp.float32)

    # ---- conv2 + bias + 2x2 max-pool: one pooled row per iteration. --------
    def pool_row(p, carry):
        r0 = 2 * p
        rows = [y1_ref[r0 + d] for d in range(4)]                # [32, 26] bf16
        acc0 = jnp.zeros((64, 24), jnp.float32)                  # conv row 2p
        acc1 = jnp.zeros((64, 24), jnp.float32)                  # conv row 2p+1
        for kh in range(3):
            for kw in range(3):
                w_tap = w2_ref[kh * 3 + kw]                      # [64, 32] bf16
                acc0 = acc0 + jnp.dot(w_tap, rows[kh][:, kw:kw + 24],
                                      preferred_element_type=jnp.float32)
                acc1 = acc1 + jnp.dot(w_tap, rows[kh + 1][:, kw:kw + 24],
                                      preferred_element_type=jnp.float32)
        # vertical max, then bias (bias commutes with max), then horizontal max
        vert = jnp.maximum(acc0, acc1) + b2_ref[...]             # [64, 24] f32
        pooled = jnp.maximum(
            jnp.dot(vert, sel_even, preferred_element_type=jnp.float32),
            jnp.dot(vert, sel_odd, preferred_element_type=jnp.float32))
        o_ref[p] = pooled.astype(o_ref.dtype)                    # [64, 12]
        return carry

    lax.fori_loop(0, 12, pool_row, 0)


def conv_stack(x_nhw, w1, b1, w2, b2):
    n = x_nhw.shape[0]
    return pl.pallas_call(
        _conv_pool_kernel,
        grid=(n,),
        out_shape=jax.ShapeDtypeStruct((n, 12, 64, 12), jnp.bfloat16),
        in_specs=[
            pl.BlockSpec((None, 28, 28), lambda i: (i, 0, 0)),   # per-image
            pl.BlockSpec((32, 9), lambda i: (0, 0)),             # resident
            pl.BlockSpec((32, 1), lambda i: (0, 0)),
            pl.BlockSpec((9, 64, 32), lambda i: (0, 0, 0)),
            pl.BlockSpec((64, 1), lambda i: (0, 0)),
        ],
        out_specs=pl.BlockSpec((None, 12, 64, 12), lambda i: (i, 0, 0, 0)),
        scratch_shapes=[pltpu.VMEM((26, 32, 26), jnp.bfloat16)],
        compiler_params=pltpu.CompilerParams(
            dimension_semantics=("parallel",)),
    )(x_nhw, w1, b1, w2, b2)


# ---------------------------- kernel 2: mlp head -----------------------------

def _mlp_head_kernel(x_ref, w1_ref, b1_ref, w2_ref, b2_ref, o_ref, acc_ref):
    """fc1 + ReLU + fc2 + log_softmax; K-tiled fc1 with an f32 accumulator."""
    k = pl.program_id(1)

    @pl.when(k == 0)
    def _init():
        acc_ref[...] = jnp.zeros_like(acc_ref)

    acc_ref[...] += jnp.dot(x_ref[...], w1_ref[...],
                            preferred_element_type=jnp.float32)

    @pl.when(k == pl.num_programs(1) - 1)
    def _finalize():
        h = jnp.maximum(acc_ref[...] + b1_ref[...], 0.0)         # f32 epilogue
        logits = jnp.dot(h.astype(jnp.bfloat16), w2_ref[...],
                         preferred_element_type=jnp.float32) + b2_ref[...]
        m = jnp.max(logits, axis=-1, keepdims=True)
        s = logits - m
        lse = jnp.log(jnp.sum(jnp.exp(s), axis=-1, keepdims=True))
        o_ref[...] = (s - lse).astype(o_ref.dtype)


def _round_up(a, b):
    return (a + b - 1) // b * b


def mlp_head(xf, w1, b1, w2, b2, *, tk=1152):
    n, kdim = xf.shape
    assert kdim % tk == 0 and tk % 128 == 0
    tb = min(128, _round_up(n, 8))              # keep M a multiple of 8 sublanes
    n_pad = _round_up(n, tb)
    if n_pad != n:
        xf = jnp.pad(xf, ((0, n_pad - n), (0, 0)))
    out = pl.pallas_call(
        _mlp_head_kernel,
        grid=(n_pad // tb, kdim // tk),
        out_shape=jax.ShapeDtypeStruct((n_pad, 10), jnp.float32),
        in_specs=[
            pl.BlockSpec((tb, tk), lambda i, k: (i, k)),
            pl.BlockSpec((tk, 128), lambda i, k: (k, 0)),
            pl.BlockSpec((1, 128), lambda i, k: (0, 0)),
            pl.BlockSpec((128, 10), lambda i, k: (0, 0)),
            pl.BlockSpec((1, 10), lambda i, k: (0, 0)),
        ],
        out_specs=pl.BlockSpec((tb, 10), lambda i, k: (i, 0)),
        scratch_shapes=[pltpu.VMEM((tb, 128), jnp.float32)],
        compiler_params=pltpu.CompilerParams(
            dimension_semantics=("parallel", "arbitrary")),
    )(xf, w1, b1, w2, b2)
    return out[:n]


# ------------------------------- parameters ---------------------------------

def init_params(key):
    ks = jax.random.split(key, 8)
    return {
        # PyTorch layouts: conv.weight [OC, IC, kh, kw]; fc weights are stored
        # already transposed as [in_features, out_features].
        "conv1_w": 0.20 * jax.random.normal(ks[0], (32, 1, 3, 3), jnp.float32),
        "conv1_b": 0.10 * jax.random.normal(ks[1], (32,), jnp.float32),
        "conv2_w": 0.05 * jax.random.normal(ks[2], (64, 32, 3, 3), jnp.float32),
        "conv2_b": 0.10 * jax.random.normal(ks[3], (64,), jnp.float32),
        "fc1_w": 0.01 * jax.random.normal(ks[4], (9216, 128), jnp.float32),
        "fc1_b": 0.10 * jax.random.normal(ks[5], (128,), jnp.float32),
        "fc2_w": 0.10 * jax.random.normal(ks[6], (128, 10), jnp.float32),
        "fc2_b": 0.10 * jax.random.normal(ks[7], (10,), jnp.float32),
    }


def prepare_params(p):
    """One-time host-side repack into kernel-friendly layouts / dtypes
    (bf16 MXU operands, f32 biases, permuted fc1 rows -> no forward transpose)."""
    w1 = p["conv1_w"].reshape(32, 9).astype(jnp.float32)           # [oc, tap]
    b1 = p["conv1_b"].reshape(32, 1).astype(jnp.float32)
    w2 = jnp.transpose(p["conv2_w"], (2, 3, 0, 1)).reshape(9, 64, 32)
    b2 = p["conv2_b"].reshape(64, 1).astype(jnp.float32)
    # fc1: permute rows from torch's (c, h, w) flatten order to the kernel's
    # (h, c, w) pooled-output order.
    fc1_w = p["fc1_w"].reshape(64, 12, 12, 128)                    # (c, h, w, f)
    fc1_w = jnp.transpose(fc1_w, (1, 0, 2, 3)).reshape(9216, 128)  # (h, c, w, f)
    return {
        "w1": w1, "b1": b1,
        "w2": w2.astype(jnp.bfloat16), "b2": b2,
        "fc1_w": fc1_w.astype(jnp.bfloat16),
        "fc1_b": p["fc1_b"].reshape(1, 128).astype(jnp.float32),
        "fc2_w": p["fc2_w"].astype(jnp.bfloat16),
        "fc2_b": p["fc2_b"].reshape(1, 10).astype(jnp.float32),
    }


# -------------------------------- forward -----------------------------------

def cnn_forward(x_nchw, kp):
    n, c, h, w = x_nchw.shape
    assert (c, h, w) == (1, 28, 28)
    x = x_nchw.reshape(n, 28, 28).astype(jnp.float32)
    # conv1 + ReLU + conv2 + 2x2 max-pool, fused (dropout1: identity, eval).
    pooled = conv_stack(x, kp["w1"], kp["b1"], kp["w2"], kp["b2"])  # [n,12,64,12]
    xf = pooled.reshape(n, 9216)          # free reshape; matches permuted fc1_w
    # fc1 + ReLU (+ dropout2 identity) + fc2 + log_softmax, fused.
    return mlp_head(xf, kp["fc1_w"], kp["fc1_b"], kp["fc2_w"], kp["fc2_b"])


def reference_forward(x_nchw, p):
    """Pure-JAX/XLA f32 reference mirroring the PyTorch module."""
    n = x_nchw.shape[0]
    dn = ("NCHW", "OIHW", "NCHW")
    y1 = lax.conv_general_dilated(x_nchw, p["conv1_w"], (1, 1), "VALID",
                                  dimension_numbers=dn)
    y1 = jnp.maximum(y1 + p["conv1_b"][None, :, None, None], 0.0)
    y2 = lax.conv_general_dilated(y1, p["conv2_w"], (1, 1), "VALID",
                                  dimension_numbers=dn)
    y2 = y2 + p["conv2_b"][None, :, None, None]
    y3 = y2.reshape(n, 64, 12, 2, 12, 2).max(axis=(3, 5))
    xf = y3.reshape(n, 9216)
    hid = jnp.maximum(xf @ p["fc1_w"] + p["fc1_b"], 0.0)
    logits = hid @ p["fc2_w"] + p["fc2_b"]
    return jax.nn.log_softmax(logits, axis=-1)


if __name__ == "__main__":
    key = jax.random.PRNGKey(0)
    k_x, k_p = jax.random.split(key)

    # MNIST-shaped input: the 9216-d fc1 requires 1x28x28 images.
    x = jax.random.normal(k_x, (2, 1, 28, 28), jnp.float32)
    params = init_params(k_p)
    kparams = prepare_params(params)          # one-time host-side repack

    out = jax.jit(cnn_forward)(x, kparams)
    out = jax.block_until_ready(out)

    assert out.shape == (2, 10) and out.dtype == jnp.float32
    # log_softmax rows exponentiate-sum to 1.
    row_sums = jnp.sum(jnp.exp(out), axis=1)
    assert bool(jnp.all(jnp.abs(row_sums - 1.0) < 1e-3))
    # cross-check against the f32 XLA reference (bf16 MXU operands -> loose tol).
    ref = jax.jit(reference_forward)(x, params)
    assert bool(jnp.max(jnp.abs(out - ref)) < 0.2)

    print("KERNEL_OK")
</pallas_src>

<mosaic_0001>
module attributes {stable_mosaic.version = 11 : i64} {
  func.func @_mlp_head_kernel(%arg0: i32, %arg1: i32, %arg2: memref<8x1152xbf16, #tpu.memory_space<vmem>>, %arg3: memref<1152x128xbf16, #tpu.memory_space<vmem>>, %arg4: memref<1x128xf32, #tpu.memory_space<vmem>>, %arg5: memref<128x10xbf16, #tpu.memory_space<vmem>>, %arg6: memref<1x10xf32, #tpu.memory_space<vmem>>, %arg7: memref<8x10xf32, #tpu.memory_space<vmem>>, %arg8: memref<8x128xf32, #tpu.memory_space<vmem>>) attributes {dimension_semantics = [#tpu.dimension_semantics<parallel>, #tpu.dimension_semantics<arbitrary>], iteration_bounds = array<i64: 1, 8>, scalar_prefetch = 0 : i64, scratch_operands = 1 : i64, tpu.core_type = #tpu.core_type<tc>, window_params = [{transform_indices = @transform_0, window_bounds = array<i64: 8, 1152>}, {transform_indices = @transform_1, window_bounds = array<i64: 1152, 128>}, {pipeline_mode = #tpu.pipeline_mode<synchronous>, transform_indices = @transform_2, window_bounds = array<i64: 1, 128>}, {pipeline_mode = #tpu.pipeline_mode<synchronous>, transform_indices = @transform_3, window_bounds = array<i64: 128, 10>}, {pipeline_mode = #tpu.pipeline_mode<synchronous>, transform_indices = @transform_4, window_bounds = array<i64: 1, 10>}, {transform_indices = @transform_5, window_bounds = array<i64: 8, 10>}]} {
    %c0_i32 = arith.constant 0 : i32
    %0 = arith.cmpi eq, %arg1, %c0_i32 : i32
    %1 = arith.extui %0 : i1 to i32
    %c0_i32_0 = arith.constant 0 : i32
    %2 = arith.cmpi ne, %1, %c0_i32_0 : i32
    scf.if %2 {
      %cst_9 = arith.constant 0.000000e+00 : f32
      %12 = vector.broadcast %cst_9 : f32 to vector<8x128xf32>
      %c0_10 = arith.constant 0 : index
      %c0_11 = arith.constant 0 : index
      %13 = vector.load %arg8[%c0_10, %c0_11] : memref<8x128xf32, #tpu.memory_space<vmem>>, vector<8x128xf32>
      tpu.vector_store %arg8[%c0_10, %c0_11], %12 {strides = array<i32>} : memref<8x128xf32, #tpu.memory_space<vmem>>, vector<8x128xf32>,
    } else {
    }
    %c0 = arith.constant 0 : index
    %c0_1 = arith.constant 0 : index
    %3 = vector.load %arg8[%c0, %c0_1] : memref<8x128xf32, #tpu.memory_space<vmem>>, vector<8x128xf32>
    %c0_2 = arith.constant 0 : index
    %c0_3 = arith.constant 0 : index
    %4 = vector.load %arg2[%c0_2, %c0_3] : memref<8x1152xbf16, #tpu.memory_space<vmem>>, vector<8x1152xbf16>
    %c0_4 = arith.constant 0 : index
    %c0_5 = arith.constant 0 : index
    %5 = vector.load %arg3[%c0_4, %c0_5] : memref<1152x128xbf16, #tpu.memory_space<vmem>>, vector<1152x128xbf16>
    %cst = arith.constant dense<0.000000e+00> : vector<8x128xf32>
    %6 = tpu.matmul %4, %5, %cst {dimension_numbers = #tpu.dot_dimension_numbers<[1], [0], [0], [1], [0, 0, 1, 1], [], []>} : vector<8x1152xbf16>, vector<1152x128xbf16>, vector<8x128xf32> -> vector<8x128xf32>
    %7 = arith.addf %3, %6 : vector<8x128xf32>
    %c0_6 = arith.constant 0 : index
    %c0_7 = arith.constant 0 : index
    %8 = vector.load %arg8[%c0_6, %c0_7] : memref<8x128xf32, #tpu.memory_space<vmem>>, vector<8x128xf32>
    tpu.vector_store %arg8[%c0_6, %c0_7], %7 {strides = array<i32>} : memref<8x128xf32, #tpu.memory_space<vmem>>, vector<8x128xf32>,
    %c7_i32 = arith.constant 7 : i32
    %9 = arith.cmpi eq, %arg1, %c7_i32 : i32
    %10 = arith.extui %9 : i1 to i32
    %c0_i32_8 = arith.constant 0 : i32
    %11 = arith.cmpi ne, %10, %c0_i32_8 : i32
    scf.if %11 {
      %c0_9 = arith.constant 0 : index
      %c0_10 = arith.constant 0 : index
      %12 = vector.load %arg8[%c0_9, %c0_10] : memref<8x128xf32, #tpu.memory_space<vmem>>, vector<8x128xf32>
      %c0_11 = arith.constant 0 : index
      %c0_12 = arith.constant 0 : index
      %13 = vector.load %arg4[%c0_11, %c0_12] : memref<1x128xf32, #tpu.memory_space<vmem>>, vector<1x128xf32>
      %14 = vector.broadcast %13 : vector<1x128xf32> to vector<8x128xf32>
      %15 = arith.addf %12, %14 : vector<8x128xf32>
      %cst_13 = arith.constant 0.000000e+00 : f32
      %16 = vector.broadcast %cst_13 : f32 to vector<8x128xf32>
      %17 = arith.maximumf %15, %16 : vector<8x128xf32>
      %18 = arith.truncf %17 : vector<8x128xf32> to vector<8x128xbf16>
      %c0_14 = arith.constant 0 : index
      %c0_15 = arith.constant 0 : index
      %19 = vector.load %arg5[%c0_14, %c0_15] : memref<128x10xbf16, #tpu.memory_space<vmem>>, vector<128x10xbf16>
      %cst_16 = arith.constant dense<0.000000e+00> : vector<8x10xf32>
      %20 = tpu.matmul %18, %19, %cst_16 {dimension_numbers = #tpu.dot_dimension_numbers<[1], [0], [0], [1], [0, 0, 1, 1], [], []>} : vector<8x128xbf16>, vector<128x10xbf16>, vector<8x10xf32> -> vector<8x10xf32>
      %c0_17 = arith.constant 0 : index
      %c0_18 = arith.constant 0 : index
      %21 = vector.load %arg6[%c0_17, %c0_18] : memref<1x10xf32, #tpu.memory_space<vmem>>, vector<1x10xf32>
      %22 = vector.broadcast %21 : vector<1x10xf32> to vector<8x10xf32>
      %23 = arith.addf %20, %22 : vector<8x10xf32>
      %cst_19 = arith.constant dense<0xFF800000> : vector<8xf32>
      %24 = vector.multi_reduction <maximumf>, %23, %cst_19 [1] : vector<8x10xf32> to vector<8xf32>
      %25 = vector.shape_cast %24 : vector<8xf32> to vector<8x1xf32>
      %26 = vector.broadcast %25 : vector<8x1xf32> to vector<8x10xf32>
      %27 = arith.subf %23, %26 : vector<8x10xf32>
      %28 = math.exp %27 : vector<8x10xf32>
      %cst_20 = arith.constant dense<0.000000e+00> : vector<8xf32>
      %29 = vector.multi_reduction <add>, %28, %cst_20 [1] : vector<8x10xf32> to vector<8xf32>
      %30 = vector.shape_cast %29 : vector<8xf32> to vector<8x1xf32>
      %31 = math.log %30 : vector<8x1xf32>
      %32 = vector.broadcast %31 : vector<8x1xf32> to vector<8x10xf32>
      %33 = arith.subf %27, %32 : vector<8x10xf32>
      %c0_21 = arith.constant 0 : index
      %c0_22 = arith.constant 0 : index
      %34 = vector.load %arg7[%c0_21, %c0_22] : memref<8x10xf32, #tpu.memory_space<vmem>>, vector<8x10xf32>
      tpu.vector_store %arg7[%c0_21, %c0_22], %33 {strides = array<i32>} : memref<8x10xf32, #tpu.memory_space<vmem>>, vector<8x10xf32>,
    } else {
    }
    return
  }
  func.func @transform_0(%arg0: i32, %arg1: i32) -> (i32, i32) {
    %c0_i32 = arith.constant 0 : i32
    return %arg0, %arg1 : i32, i32
  }
  func.func @transform_1(%arg0: i32, %arg1: i32) -> (i32, i32) {
    %c0_i32 = arith.constant 0 : i32
    %c0_i32_0 = arith.constant 0 : i32
    return %arg1, %c0_i32 : i32, i32
  }
  func.func @transform_2(%arg0: i32, %arg1: i32) -> (i32, i32) {
    %c0_i32 = arith.constant 0 : i32
    %c0_i32_0 = arith.constant 0 : i32
    %c0_i32_1 = arith.constant 0 : i32
    return %c0_i32, %c0_i32_0 : i32, i32
  }
  func.func @transform_3(%arg0: i32, %arg1: i32) -> (i32, i32) {
    %c0_i32 = arith.constant 0 : i32
    %c0_i32_0 = arith.constant 0 : i32
    %c0_i32_1 = arith.constant 0 : i32
    return %c0_i32, %c0_i32_0 : i32, i32
  }
  func.func @transform_4(%arg0: i32, %arg1: i32) -> (i32, i32) {
    %c0_i32 = arith.constant 0 : i32
    %c0_i32_0 = arith.constant 0 : i32
    %c0_i32_1 = arith.constant 0 : i32
    return %c0_i32, %c0_i32_0 : i32, i32
  }
  func.func @transform_5(%arg0: i32, %arg1: i32) -> (i32, i32) {
    %c0_i32 = arith.constant 0 : i32
    %c0_i32_0 = arith.constant 0 : i32
    return %arg0, %c0_i32 : i32, i32
  }
}

module attributes {stable_mosaic.version = 11 : i64} {
  func.func @_conv_pool_kernel(%arg0: i32, %arg1: memref<1x28x28xf32, #tpu.memory_space<vmem>>, %arg2: memref<32x9xf32, #tpu.memory_space<vmem>>, %arg3: memref<32x1xf32, #tpu.memory_space<vmem>>, %arg4: memref<9x64x32xbf16, #tpu.memory_space<vmem>>, %arg5: memref<64x1xf32, #tpu.memory_space<vmem>>, %arg6: memref<1x12x64x12xbf16, #tpu.memory_space<vmem>>, %arg7: memref<26x32x26xbf16, #tpu.memory_space<vmem>>) attributes {dimension_semantics = [#tpu.dimension_semantics<parallel>], iteration_bounds = array<i64: 2>, scalar_prefetch = 0 : i64, scratch_operands = 1 : i64, tpu.core_type = #tpu.core_type<tc>, window_params = [{transform_indices = @transform_0, window_bounds = array<i64: 1, 28, 28>}, {pipeline_mode = #tpu.pipeline_mode<synchronous>, transform_indices = @transform_1, window_bounds = array<i64: 32, 9>}, {pipeline_mode = #tpu.pipeline_mode<synchronous>, transform_indices = @transform_2, window_bounds = array<i64: 32, 1>}, {pipeline_mode = #tpu.pipeline_mode<synchronous>, transform_indices = @transform_3, window_bounds = array<i64: 9, 64, 32>}, {pipeline_mode = #tpu.pipeline_mode<synchronous>, transform_indices = @transform_4, window_bounds = array<i64: 64, 1>}, {transform_indices = @transform_5, window_bounds = array<i64: 1, 12, 64, 12>}]} {
    %c0_i32 = arith.constant 0 : i32
    %c26_i32 = arith.constant 26 : i32
    %0 = arith.addi %c0_i32, %c26_i32 : i32
    %c1_i32 = arith.constant 1 : i32
    scf.for %arg8 = %c0_i32 to %0 step %c1_i32  : i32 {
      %cst = arith.constant 0.000000e+00 : f32
      %16 = vector.broadcast %cst : f32 to vector<32x26xf32>
      %c0_i32_6 = arith.constant 0 : i32
      %17 = arith.addi %arg8, %c0_i32_6 : i32
      %c0 = arith.constant 0 : index
      %18 = arith.index_cast %17 : i32 to index
      %c0_7 = arith.constant 0 : index
      %19 = vector.load %arg1[%c0, %18, %c0_7] : memref<1x28x28xf32, #tpu.memory_space<vmem>>, vector<1x1x28xf32>
      %20 = vector.shape_cast %19 : vector<1x1x28xf32> to vector<1x28xf32>
      %c0_8 = arith.constant 0 : index
      %c0_9 = arith.constant 0 : index
      %21 = vector.load %arg2[%c0_8, %c0_9] : memref<32x9xf32, #tpu.memory_space<vmem>>, vector<32x1xf32>
      %22 = vector.extract_strided_slice %20 {offsets = [0, 0], sizes = [1, 26], strides = [1, 1]} : vector<1x28xf32> to vector<1x26xf32>
      %23 = vector.broadcast %21 : vector<32x1xf32> to vector<32x26xf32>
      %24 = vector.broadcast %22 : vector<1x26xf32> to vector<32x26xf32>
      %25 = arith.mulf %23, %24 : vector<32x26xf32>
      %26 = arith.addf %16, %25 : vector<32x26xf32>
      %c0_10 = arith.constant 0 : index
      %c1 = arith.constant 1 : index
      %27 = vector.load %arg2[%c0_10, %c1] : memref<32x9xf32, #tpu.memory_space<vmem>>, vector<32x1xf32>
      %28 = vector.extract_strided_slice %20 {offsets = [0, 1], sizes = [1, 26], strides = [1, 1]} : vector<1x28xf32> to vector<1x26xf32>
      %29 = vector.broadcast %27 : vector<32x1xf32> to vector<32x26xf32>
      %30 = vector.broadcast %28 : vector<1x26xf32> to vector<32x26xf32>
      %31 = arith.mulf %29, %30 : vector<32x26xf32>
      %32 = arith.addf %26, %31 : vector<32x26xf32>
      %c0_11 = arith.constant 0 : index
      %c2 = arith.constant 2 : index
      %33 = vector.load %arg2[%c0_11, %c2] : memref<32x9xf32, #tpu.memory_space<vmem>>, vector<32x1xf32>
      %34 = vector.extract_strided_slice %20 {offsets = [0, 2], sizes = [1, 26], strides = [1, 1]} : vector<1x28xf32> to vector<1x26xf32>
      %35 = vector.broadcast %33 : vector<32x1xf32> to vector<32x26xf32>
      %36 = vector.broadcast %34 : vector<1x26xf32> to vector<32x26xf32>
      %37 = arith.mulf %35, %36 : vector<32x26xf32>
      %38 = arith.addf %32, %37 : vector<32x26xf32>
      %c1_i32_12 = arith.constant 1 : i32
      %39 = arith.addi %arg8, %c1_i32_12 : i32
      %c0_13 = arith.constant 0 : index
      %40 = arith.index_cast %39 : i32 to index
      %c0_14 = arith.constant 0 : index
      %41 = vector.load %arg1[%c0_13, %40, %c0_14] : memref<1x28x28xf32, #tpu.memory_space<vmem>>, vector<1x1x28xf32>
      %42 = vector.shape_cast %41 : vector<1x1x28xf32> to vector<1x28xf32>
      %c0_15 = arith.constant 0 : index
      %c3 = arith.constant 3 : index
      %43 = vector.load %arg2[%c0_15, %c3] : memref<32x9xf32, #tpu.memory_space<vmem>>, vector<32x1xf32>
      %44 = vector.extract_strided_slice %42 {offsets = [0, 0], sizes = [1, 26], strides = [1, 1]} : vector<1x28xf32> to vector<1x26xf32>
      %45 = vector.broadcast %43 : vector<32x1xf32> to vector<32x26xf32>
      %46 = vector.broadcast %44 : vector<1x26xf32> to vector<32x26xf32>
      %47 = arith.mulf %45, %46 : vector<32x26xf32>
      %48 = arith.addf %38, %47 : vector<32x26xf32>
      %c0_16 = arith.constant 0 : index
      %c4 = arith.constant 4 : index
      %49 = vector.load %arg2[%c0_16, %c4] : memref<32x9xf32, #tpu.memory_space<vmem>>, vector<32x1xf32>
      %50 = vector.extract_strided_slice %42 {offsets = [0, 1], sizes = [1, 26], strides = [1, 1]} : vector<1x28xf32> to vector<1x26xf32>
      %51 = vector.broadcast %49 : vector<32x1xf32> to vector<32x26xf32>
      %52 = vector.broadcast %50 : vector<1x26xf32> to vector<32x26xf32>
      %53 = arith.mulf %51, %52 : vector<32x26xf32>
      %54 = arith.addf %48, %53 : vector<32x26xf32>
      %c0_17 = arith.constant 0 : index
      %c5 = arith.constant 5 : index
      %55 = vector.load %arg2[%c0_17, %c5] : memref<32x9xf32, #tpu.memory_space<vmem>>, vector<32x1xf32>
      %56 = vector.extract_strided_slice %42 {offsets = [0, 2], sizes = [1, 26], strides = [1, 1]} : vector<1x28xf32> to vector<1x26xf32>
      %57 = vector.broadcast %55 : vector<32x1xf32> to vector<32x26xf32>
      %58 = vector.broadcast %56 : vector<1x26xf32> to vector<32x26xf32>
      %59 = arith.mulf %57, %58 : vector<32x26xf32>
      %60 = arith.addf %54, %59 : vector<32x26xf32>
      %c2_i32_18 = arith.constant 2 : i32
      %61 = arith.addi %arg8, %c2_i32_18 : i32
      %c0_19 = arith.constant 0 : index
      %62 = arith.index_cast %61 : i32 to index
      %c0_20 = arith.constant 0 : index
      %63 = vector.load %arg1[%c0_19, %62, %c0_20] : memref<1x28x28xf32, #tpu.memory_space<vmem>>, vector<1x1x28xf32>
      %64 = vector.shape_cast %63 : vector<1x1x28xf32> to vector<1x28xf32>
      %c0_21 = arith.constant 0 : index
      %c6 = arith.constant 6 : index
      %65 = vector.load %arg2[%c0_21, %c6] : memref<32x9xf32, #tpu.memory_space<vmem>>, vector<32x1xf32>
      %66 = vector.extract_strided_slice %64 {offsets = [0, 0], sizes = [1, 26], strides = [1, 1]} : vector<1x28xf32> to vector<1x26xf32>
      %67 = vector.broadcast %65 : vector<32x1xf32> to vector<32x26xf32>
      %68 = vector.broadcast %66 : vector<1x26xf32> to vector<32x26xf32>
      %69 = arith.mulf %67, %68 : vector<32x26xf32>
      %70 = arith.addf %60, %69 : vector<32x26xf32>
      %c0_22 = arith.constant 0 : index
      %c7 = arith.constant 7 : index
      %71 = vector.load %arg2[%c0_22, %c7] : memref<32x9xf32, #tpu.memory_space<vmem>>, vector<32x1xf32>
      %72 = vector.extract_strided_slice %64 {offsets = [0, 1], sizes = [1, 26], strides = [1, 1]} : vector<1x28xf32> to vector<1x26xf32>
      %73 = vector.broadcast %71 : vector<32x1xf32> to vector<32x26xf32>
      %74 = vector.broadcast %72 : vector<1x26xf32> to vector<32x26xf32>
      %75 = arith.mulf %73, %74 : vector<32x26xf32>
      %76 = arith.addf %70, %75 : vector<32x26xf32>
      %c0_23 = arith.constant 0 : index
      %c8 = arith.constant 8 : index
      %77 = vector.load %arg2[%c0_23, %c8] : memref<32x9xf32, #tpu.memory_space<vmem>>, vector<32x1xf32>
      %78 = vector.extract_strided_slice %64 {offsets = [0, 2], sizes = [1, 26], strides = [1, 1]} : vector<1x28xf32> to vector<1x26xf32>
      %79 = vector.broadcast %77 : vector<32x1xf32> to vector<32x26xf32>
      %80 = vector.broadcast %78 : vector<1x26xf32> to vector<32x26xf32>
      %81 = arith.mulf %79, %80 : vector<32x26xf32>
      %82 = arith.addf %76, %81 : vector<32x26xf32>
      %c0_24 = arith.constant 0 : index
      %c0_25 = arith.constant 0 : index
      %83 = vector.load %arg3[%c0_24, %c0_25] : memref<32x1xf32, #tpu.memory_space<vmem>>, vector<32x1xf32>
      %84 = vector.broadcast %83 : vector<32x1xf32> to vector<32x26xf32>
      %85 = arith.addf %82, %84 : vector<32x26xf32>
      %cst_26 = arith.constant 0.000000e+00 : f32
      %86 = vector.broadcast %cst_26 : f32 to vector<32x26xf32>
      %87 = arith.maximumf %85, %86 : vector<32x26xf32>
      %88 = arith.truncf %87 : vector<32x26xf32> to vector<32x26xbf16>
      %89 = arith.index_cast %arg8 : i32 to index
      %c0_27 = arith.constant 0 : index
      %c0_28 = arith.constant 0 : index
      %90 = vector.load %arg7[%89, %c0_27, %c0_28] : memref<26x32x26xbf16, #tpu.memory_space<vmem>>, vector<1x32x26xbf16>
      %91 = vector.shape_cast %90 : vector<1x32x26xbf16> to vector<32x26xbf16>
      %92 = vector.shape_cast %88 : vector<32x26xbf16> to vector<1x32x26xbf16>
      tpu.vector_store %arg7[%89, %c0_27, %c0_28], %92 {strides = array<i32>} : memref<26x32x26xbf16, #tpu.memory_space<vmem>>, vector<1x32x26xbf16>,
    }
    %c26_i32_0 = arith.constant 26 : i32
    %1 = tpu.iota {dimensions = array<i32: 0>} : vector<24x12xi32>
    %2 = tpu.iota {dimensions = array<i32: 1>} : vector<24x12xi32>
    %c2_i32 = arith.constant 2 : i32
    %3 = vector.broadcast %c2_i32 : i32 to vector<24x12xi32>
    %4 = arith.muli %3, %2 : vector<24x12xi32>
    %5 = arith.cmpi eq, %1, %4 : vector<24x12xi32>
    %6 = arith.extui %5 : vector<24x12xi1> to vector<24x12xi32>
    %7 = arith.sitofp %6 : vector<24x12xi32> to vector<24x12xf32>
    %c2_i32_1 = arith.constant 2 : i32
    %8 = vector.broadcast %c2_i32_1 : i32 to vector<24x12xi32>
    %9 = arith.muli %8, %2 : vector<24x12xi32>
    %c1_i32_2 = arith.constant 1 : i32
    %10 = vector.broadcast %c1_i32_2 : i32 to vector<24x12xi32>
    %11 = arith.addi %9, %10 : vector<24x12xi32>
    %12 = arith.cmpi eq, %1, %11 : vector<24x12xi32>
    %13 = arith.extui %12 : vector<24x12xi1> to vector<24x12xi32>
    %14 = arith.sitofp %13 : vector<24x12xi32> to vector<24x12xf32>
    %c0_i32_3 = arith.constant 0 : i32
    %c12_i32 = arith.constant 12 : i32
    %15 = arith.addi %c0_i32_3, %c12_i32 : i32
    %c1_i32_4 = arith.constant 1 : i32
    scf.for %arg8 = %c0_i32_3 to %15 step %c1_i32_4  : i32 {
      %c2_i32_6 = arith.constant 2 : i32
      %16 = arith.muli %c2_i32_6, %arg8 : i32
      %c0_i32_7 = arith.constant 0 : i32
      %17 = arith.addi %16, %c0_i32_7 : i32
      %18 = arith.index_cast %17 : i32 to index
      %c0 = arith.constant 0 : index
      %c0_8 = arith.constant 0 : index
      %19 = vector.load %arg7[%18, %c0, %c0_8] : memref<26x32x26xbf16, #tpu.memory_space<vmem>>, vector<1x32x26xbf16>
      %20 = vector.shape_cast %19 : vector<1x32x26xbf16> to vector<32x26xbf16>
      %c1_i32_9 = arith.constant 1 : i32
      %21 = arith.addi %16, %c1_i32_9 : i32
      %22 = arith.index_cast %21 : i32 to index
      %c0_10 = arith.constant 0 : index
      %c0_11 = arith.constant 0 : index
      %23 = vector.load %arg7[%22, %c0_10, %c0_11] : memref<26x32x26xbf16, #tpu.memory_space<vmem>>, vector<1x32x26xbf16>
      %24 = vector.shape_cast %23 : vector<1x32x26xbf16> to vector<32x26xbf16>
      %c2_i32_12 = arith.constant 2 : i32
      %25 = arith.addi %16, %c2_i32_12 : i32
      %26 = arith.index_cast %25 : i32 to index
      %c0_13 = arith.constant 0 : index
      %c0_14 = arith.constant 0 : index
      %27 = vector.load %arg7[%26, %c0_13, %c0_14] : memref<26x32x26xbf16, #tpu.memory_space<vmem>>, vector<1x32x26xbf16>
      %28 = vector.shape_cast %27 : vector<1x32x26xbf16> to vector<32x26xbf16>
      %c3_i32 = arith.constant 3 : i32
      %29 = arith.addi %16, %c3_i32 : i32
      %30 = arith.index_cast %29 : i32 to index
      %c0_15 = arith.constant 0 : index
      %c0_16 = arith.constant 0 : index
      %31 = vector.load %arg7[%30, %c0_15, %c0_16] : memref<26x32x26xbf16, #tpu.memory_space<vmem>>, vector<1x32x26xbf16>
      %32 = vector.shape_cast %31 : vector<1x32x26xbf16> to vector<32x26xbf16>
      %cst = arith.constant 0.000000e+00 : f32
      %33 = vector.broadcast %cst : f32 to vector<64x24xf32>
      %cst_17 = arith.constant 0.000000e+00 : f32
      %34 = vector.broadcast %cst_17 : f32 to vector<64x24xf32>
      %c0_18 = arith.constant 0 : index
      %c0_19 = arith.constant 0 : index
      %c0_20 = arith.constant 0 : index
      %35 = vector.load %arg4[%c0_18, %c0_19, %c0_20] : memref<9x64x32xbf16, #tpu.memory_space<vmem>>, vector<1x64x32xbf16>
      %36 = vector.shape_cast %35 : vector<1x64x32xbf16> to vector<64x32xbf16>
      %37 = vector.extract_strided_slice %20 {offsets = [0, 0], sizes = [32, 24], strides = [1, 1]} : vector<32x26xbf16> to vector<32x24xbf16>
      %cst_21 = arith.constant dense<0.000000e+00> : vector<64x24xf32>
      %38 = tpu.matmul %36, %37, %cst_21 {dimension_numbers = #tpu.dot_dimension_numbers<[1], [0], [0], [1], [0, 0, 1, 1], [], []>} : vector<64x32xbf16>, vector<32x24xbf16>, vector<64x24xf32> -> vector<64x24xf32>
      %39 = arith.addf %33, %38 : vector<64x24xf32>
      %40 = vector.extract_strided_slice %24 {offsets = [0, 0], sizes = [32, 24], strides = [1, 1]} : vector<32x26xbf16> to vector<32x24xbf16>
      %cst_22 = arith.constant dense<0.000000e+00> : vector<64x24xf32>
      %41 = tpu.matmul %36, %40, %cst_22 {dimension_numbers = #tpu.dot_dimension_numbers<[1], [0], [0], [1], [0, 0, 1, 1], [], []>} : vector<64x32xbf16>, vector<32x24xbf16>, vector<64x24xf32> -> vector<64x24xf32>
      %42 = arith.addf %34, %41 : vector<64x24xf32>
      %c1 = arith.constant 1 : index
      %c0_23 = arith.constant 0 : index
      %c0_24 = arith.constant 0 : index
      %43 = vector.load %arg4[%c1, %c0_23, %c0_24] : memref<9x64x32xbf16, #tpu.memory_space<vmem>>, vector<1x64x32xbf16>
      %44 = vector.shape_cast %43 : vector<1x64x32xbf16> to vector<64x32xbf16>
      %45 = vector.extract_strided_slice %20 {offsets = [0, 1], sizes = [32, 24], strides = [1, 1]} : vector<32x26xbf16> to vector<32x24xbf16>
      %cst_25 = arith.constant dense<0.000000e+00> : vector<64x24xf32>
      %46 = tpu.matmul %44, %45, %cst_25 {dimension_numbers = #tpu.dot_dimension_numbers<[1], [0], [0], [1], [0, 0, 1, 1], [], []>} : vector<64x32xbf16>, vector<32x24xbf16>, vector<64x24xf32> -> vector<64x24xf32>
      %47 = arith.addf %39, %46 : vector<64x24xf32>
      %48 = vector.extract_strided_slice %24 {offsets = [0, 1], sizes = [32, 24], strides = [1, 1]} : vector<32x26xbf16> to vector<32x24xbf16>
      %cst_26 = arith.constant dense<0.000000e+00> : vector<64x24xf32>
      %49 = tpu.matmul %44, %48, %cst_26 {dimension_numbers = #tpu.dot_dimension_numbers<[1], [0], [0], [1], [0, 0, 1, 1], [], []>} : vector<64x32xbf16>, vector<32x24xbf16>, vector<64x24xf32> -> vector<64x24xf32>
      %50 = arith.addf %42, %49 : vector<64x24xf32>
      %c2 = arith.constant 2 : index
      %c0_27 = arith.constant 0 : index
      %c0_28 = arith.constant 0 : index
      %51 = vector.load %arg4[%c2, %c0_27, %c0_28] : memref<9x64x32xbf16, #tpu.memory_space<vmem>>, vector<1x64x32xbf16>
      %52 = vector.shape_cast %51 : vector<1x64x32xbf16> to vector<64x32xbf16>
      %53 = vector.extract_strided_slice %20 {offsets = [0, 2], sizes = [32, 24], strides = [1, 1]} : vector<32x26xbf16> to vector<32x24xbf16>
      %cst_29 = arith.constant dense<0.000000e+00> : vector<64x24xf32>
      %54 = tpu.matmul %52, %53, %cst_29 {dimension_numbers = #tpu.dot_dimension_numbers<[1], [0], [0], [1], [0, 0, 1, 1], [], []>} : vector<64x32xbf16>, vector<32x24xbf16>, vector<64x24xf32> -> vector<64x24xf32>
      %55 = arith.addf %47, %54 : vector<64x24xf32>
      %56 = vector.extract_strided_slice %24 {offsets = [0, 2], sizes = [32, 24], strides = [1, 1]} : vector<32x26xbf16> to vector<32x24xbf16>
      %cst_30 = arith.constant dense<0.000000e+00> : vector<64x24xf32>
      %57 = tpu.matmul %52, %56, %cst_30 {dimension_numbers = #tpu.dot_dimension_numbers<[1], [0], [0], [1], [0, 0, 1, 1], [], []>} : vector<64x32xbf16>, vector<32x24xbf16>, vector<64x24xf32> -> vector<64x24xf32>
      %58 = arith.addf %50, %57 : vector<64x24xf32>
      %c3 = arith.constant 3 : index
      %c0_31 = arith.constant 0 : index
      %c0_32 = arith.constant 0 : index
      %59 = vector.load %arg4[%c3, %c0_31, %c0_32] : memref<9x64x32xbf16, #tpu.memory_space<vmem>>, vector<1x64x32xbf16>
      %60 = vector.shape_cast %59 : vector<1x64x32xbf16> to vector<64x32xbf16>
      %61 = vector.extract_strided_slice %24 {offsets = [0, 0], sizes = [32, 24], strides = [1, 1]} : vector<32x26xbf16> to vector<32x24xbf16>
      %cst_33 = arith.constant dense<0.000000e+00> : vector<64x24xf32>
      %62 = tpu.matmul %60, %61, %cst_33 {dimension_numbers = #tpu.dot_dimension_numbers<[1], [0], [0], [1], [0, 0, 1, 1], [], []>} : vector<64x32xbf16>, vector<32x24xbf16>, vector<64x24xf32> -> vector<64x24xf32>
      %63 = arith.addf %55, %62 : vector<64x24xf32>
      %64 = vector.extract_strided_slice %28 {offsets = [0, 0], sizes = [32, 24], strides = [1, 1]} : vector<32x26xbf16> to vector<32x24xbf16>
      %cst_34 = arith.constant dense<0.000000e+00> : vector<64x24xf32>
      %65 = tpu.matmul %60, %64, %cst_34 {dimension_numbers = #tpu.dot_dimension_numbers<[1], [0], [0], [1], [0, 0, 1, 1], [], []>} : vector<64x32xbf16>, vector<32x24xbf16>, vector<64x24xf32> -> vector<64x24xf32>
      %66 = arith.addf %58, %65 : vector<64x24xf32>
      %c4 = arith.constant 4 : index
      %c0_35 = arith.constant 0 : index
      %c0_36 = arith.constant 0 : index
      %67 = vector.load %arg4[%c4, %c0_35, %c0_36] : memref<9x64x32xbf16, #tpu.memory_space<vmem>>, vector<1x64x32xbf16>
      %68 = vector.shape_cast %67 : vector<1x64x32xbf16> to vector<64x32xbf16>
      %69 = vector.extract_strided_slice %24 {offsets = [0, 1], sizes = [32, 24], strides = [1, 1]} : vector<32x26xbf16> to vector<32x24xbf16>
      %cst_37 = arith.constant dense<0.000000e+00> : vector<64x24xf32>
      %70 = tpu.matmul %68, %69, %cst_37 {dimension_numbers = #tpu.dot_dimension_numbers<[1], [0], [0], [1], [0, 0, 1, 1], [], []>} : vector<64x32xbf16>, vector<32x24xbf16>, vector<64x24xf32> -> vector<64x24xf32>
      %71 = arith.addf %63, %70 : vector<64x24xf32>
      %72 = vector.extract_strided_slice %28 {offsets = [0, 1], sizes = [32, 24], strides = [1, 1]} : vector<32x26xbf16> to vector<32x24xbf16>
      %cst_38 = arith.constant dense<0.000000e+00> : vector<64x24xf32>
      %73 = tpu.matmul %68, %72, %cst_38 {dimension_numbers = #tpu.dot_dimension_numbers<[1], [0], [0], [1], [0, 0, 1, 1], [], []>} : vector<64x32xbf16>, vector<32x24xbf16>, vector<64x24xf32> -> vector<64x24xf32>
      %74 = arith.addf %66, %73 : vector<64x24xf32>
      %c5 = arith.constant 5 : index
      %c0_39 = arith.constant 0 : index
      %c0_40 = arith.constant 0 : index
      %75 = vector.load %arg4[%c5, %c0_39, %c0_40] : memref<9x64x32xbf16, #tpu.memory_space<vmem>>, vector<1x64x32xbf16>
      %76 = vector.shape_cast %75 : vector<1x64x32xbf16> to vector<64x32xbf16>
      %77 = vector.extract_strided_slice %24 {offsets = [0, 2], sizes = [32, 24], strides = [1, 1]} : vector<32x26xbf16> to vector<32x24xbf16>
      %cst_41 = arith.constant dense<0.000000e+00> : vector<64x24xf32>
      %78 = tpu.matmul %76, %77, %cst_41 {dimension_numbers = #tpu.dot_dimension_numbers<[1], [0], [0], [1], [0, 0, 1, 1], [], []>} : vector<64x32xbf16>, vector<32x24xbf16>, vector<64x24xf32> -> vector<64x24xf32>
      %79 = arith.addf %71, %78 : vector<64x24xf32>
      %80 = vector.extract_strided_slice %28 {offsets = [0, 2], sizes = [32, 24], strides = [1, 1]} : vector<32x26xbf16> to vector<32x24xbf16>
      %cst_42 = arith.constant dense<0.000000e+00> : vector<64x24xf32>
      %81 = tpu.matmul %76, %80, %cst_42 {dimension_numbers = #tpu.dot_dimension_numbers<[1], [0], [0], [1], [0, 0, 1, 1], [], []>} : vector<64x32xbf16>, vector<32x24xbf16>, vector<64x24xf32> -> vector<64x24xf32>
      %82 = arith.addf %74, %81 : vector<64x24xf32>
      %c6 = arith.constant 6 : index
      %c0_43 = arith.constant 0 : index
      %c0_44 = arith.constant 0 : index
      %83 = vector.load %arg4[%c6, %c0_43, %c0_44] : memref<9x64x32xbf16, #tpu.memory_space<vmem>>, vector<1x64x32xbf16>
      %84 = vector.shape_cast %83 : vector<1x64x32xbf16> to vector<64x32xbf16>
      %85 = vector.extract_strided_slice %28 {offsets = [0, 0], sizes = [32, 24], strides = [1, 1]} : vector<32x26xbf16> to vector<32x24xbf16>
      %cst_45 = arith.constant dense<0.000000e+00> : vector<64x24xf32>
      %86 = tpu.matmul %84, %85, %cst_45 {dimension_numbers = #tpu.dot_dimension_numbers<[1], [0], [0], [1], [0, 0, 1, 1], [], []>} : vector<64x32xbf16>, vector<32x24xbf16>, vector<64x24xf32> -> vector<64x24xf32>
      %87 = arith.addf %79, %86 : vector<64x24xf32>
      %88 = vector.extract_strided_slice %32 {offsets = [0, 0], sizes = [32, 24], strides = [1, 1]} : vector<32x26xbf16> to vector<32x24xbf16>
      %cst_46 = arith.constant dense<0.000000e+00> : vector<64x24xf32>
      %89 = tpu.matmul %84, %88, %cst_46 {dimension_numbers = #tpu.dot_dimension_numbers<[1], [0], [0], [1], [0, 0, 1, 1], [], []>} : vector<64x32xbf16>, vector<32x24xbf16>, vector<64x24xf32> -> vector<64x24xf32>
      %90 = arith.addf %82, %89 : vector<64x24xf32>
      %c7 = arith.constant 7 : index
      %c0_47 = arith.constant 0 : index
      %c0_48 = arith.constant 0 : index
      %91 = vector.load %arg4[%c7, %c0_47, %c0_48] : memref<9x64x32xbf16, #tpu.memory_space<vmem>>, vector<1x64x32xbf16>
      %92 = vector.shape_cast %91 : vector<1x64x32xbf16> to vector<64x32xbf16>
      %93 = vector.extract_strided_slice %28 {offsets = [0, 1], sizes = [32, 24], strides = [1, 1]} : vector<32x26xbf16> to vector<32x24xbf16>
      %cst_49 = arith.constant dense<0.000000e+00> : vector<64x24xf32>
      %94 = tpu.matmul %92, %93, %cst_49 {dimension_numbers = #tpu.dot_dimension_numbers<[1], [0], [0], [1], [0, 0, 1, 1], [], []>} : vector<64x32xbf16>, vector<32x24xbf16>, vector<64x24xf32> -> vector<64x24xf32>
      %95 = arith.addf %87, %94 : vector<64x24xf32>
      %96 = vector.extract_strided_slice %32 {offsets = [0, 1], sizes = [32, 24], strides = [1, 1]} : vector<32x26xbf16> to vector<32x24xbf16>
      %cst_50 = arith.constant dense<0.000000e+00> : vector<64x24xf32>
      %97 = tpu.matmul %92, %96, %cst_50 {dimension_numbers = #tpu.dot_dimension_numbers<[1], [0], [0], [1], [0, 0, 1, 1], [], []>} : vector<64x32xbf16>, vector<32x24xbf16>, vector<64x24xf32> -> vector<64x24xf32>
      %98 = arith.addf %90, %97 : vector<64x24xf32>
      %c8 = arith.constant 8 : index
      %c0_51 = arith.constant 0 : index
      %c0_52 = arith.constant 0 : index
      %99 = vector.load %arg4[%c8, %c0_51, %c0_52] : memref<9x64x32xbf16, #tpu.memory_space<vmem>>, vector<1x64x32xbf16>
      %100 = vector.shape_cast %99 : vector<1x64x32xbf16> to vector<64x32xbf16>
      %101 = vector.extract_strided_slice %28 {offsets = [0, 2], sizes = [32, 24], strides = [1, 1]} : vector<32x26xbf16> to vector<32x24xbf16>
      %cst_53 = arith.constant dense<0.000000e+00> : vector<64x24xf32>
      %102 = tpu.matmul %100, %101, %cst_53 {dimension_numbers = #tpu.dot_dimension_numbers<[1], [0], [0], [1], [0, 0, 1, 1], [], []>} : vector<64x32xbf16>, vector<32x24xbf16>, vector<64x24xf32> -> vector<64x24xf32>
      %103 = arith.addf %95, %102 : vector<64x24xf32>
      %104 = vector.extract_strided_slice %32 {offsets = [0, 2], sizes = [32, 24], strides = [1, 1]} : vector<32x26xbf16> to vector<32x24xbf16>
      %cst_54 = arith.constant dense<0.000000e+00> : vector<64x24xf32>
      %105 = tpu.matmul %100, %104, %cst_54 {dimension_numbers = #tpu.dot_dimension_numbers<[1], [0], [0], [1], [0, 0, 1, 1], [], []>} : vector<64x32xbf16>, vector<32x24xbf16>, vector<64x24xf32> -> vector<64x24xf32>
      %106 = arith.addf %98, %105 : vector<64x24xf32>
      %107 = arith.maximumf %103, %106 : vector<64x24xf32>
      %c0_55 = arith.constant 0 : index
      %c0_56 = arith.constant 0 : index
      %108 = vector.load %arg5[%c0_55, %c0_56] : memref<64x1xf32, #tpu.memory_space<vmem>>, vector<64x1xf32>
      %109 = vector.broadcast %108 : vector<64x1xf32> to vector<64x24xf32>
      %110 = arith.addf %107, %109 : vector<64x24xf32>
      %cst_57 = arith.constant dense<0.000000e+00> : vector<64x12xf32>
      %111 = tpu.matmul %110, %7, %cst_57 {dimension_numbers = #tpu.dot_dimension_numbers<[1], [0], [0], [1], [0, 0, 1, 1], [], []>} : vector<64x24xf32>, vector<24x12xf32>, vector<64x12xf32> -> vector<64x12xf32>
      %cst_58 = arith.constant dense<0.000000e+00> : vector<64x12xf32>
      %112 = tpu.matmul %110, %14, %cst_58 {dimension_numbers = #tpu.dot_dimension_numbers<[1], [0], [0], [1], [0, 0, 1, 1], [], []>} : vector<64x24xf32>, vector<24x12xf32>, vector<64x12xf32> -> vector<64x12xf32>
      %113 = arith.maximumf %111, %112 : vector<64x12xf32>
      %114 = arith.truncf %113 : vector<64x12xf32> to vector<64x12xbf16>
      %c0_59 = arith.constant 0 : index
      %115 = arith.index_cast %arg8 : i32 to index
      %c0_60 = arith.constant 0 : index
      %c0_61 = arith.constant 0 : index
      %116 = vector.load %arg6[%c0_59, %115, %c0_60, %c0_61] : memref<1x12x64x12xbf16, #tpu.memory_space<vmem>>, vector<1x1x64x12xbf16>
      %117 = vector.shape_cast %116 : vector<1x1x64x12xbf16> to vector<64x12xbf16>
      %118 = vector.shape_cast %114 : vector<64x12xbf16> to vector<1x1x64x12xbf16>
      tpu.vector_store %arg6[%c0_59, %115, %c0_60, %c0_61], %118 {strides = array<i32>} : memref<1x12x64x12xbf16, #tpu.memory_space<vmem>>, vector<1x1x64x12xbf16>,
    }
    %c12_i32_5 = arith.constant 12 : i32
    return
  }
  func.func @transform_0(%arg0: i32) -> (i32, i32, i32) {
    %c0_i32 = arith.constant 0 : i32
    %c0_i32_0 = arith.constant 0 : i32
    %c0_i32_1 = arith.constant 0 : i32
    return %arg0, %c0_i32, %c0_i32_0 : i32, i32, i32
  }
  func.func @transform_1(%arg0: i32) -> (i32, i32) {
    %c0_i32 = arith.constant 0 : i32
    %c0_i32_0 = arith.constant 0 : i32
    %c0_i32_1 = arith.constant 0 : i32
    return %c0_i32, %c0_i32_0 : i32, i32
  }
  func.func @transform_2(%arg0: i32) -> (i32, i32) {
    %c0_i32 = arith.constant 0 : i32
    %c0_i32_0 = arith.constant 0 : i32
    %c0_i32_1 = arith.constant 0 : i32
    return %c0_i32, %c0_i32_0 : i32, i32
  }
  func.func @transform_3(%arg0: i32) -> (i32, i32, i32) {
    %c0_i32 = arith.constant 0 : i32
    %c0_i32_0 = arith.constant 0 : i32
    %c0_i32_1 = arith.constant 0 : i32
    %c0_i32_2 = arith.constant 0 : i32
    return %c0_i32, %c0_i32_0, %c0_i32_1 : i32, i32, i32
  }
  func.func @transform_4(%arg0: i32) -> (i32, i32) {
    %c0_i32 = arith.constant 0 : i32
    %c0_i32_0 = arith.constant 0 : i32
    %c0_i32_1 = arith.constant 0 : i32
    return %c0_i32, %c0_i32_0 : i32, i32
  }
  func.func @transform_5(%arg0: i32) -> (i32, i32, i32, i32) {
    %c0_i32 = arith.constant 0 : i32
    %c0_i32_0 = arith.constant 0 : i32
    %c0_i32_1 = arith.constant 0 : i32
    %c0_i32_2 = arith.constant 0 : i32
    return %arg0, %c0_i32, %c0_i32_0, %c0_i32_1 : i32, i32, i32, i32
  }
}

</mosaic_0001>

<bundles_post_ra>
// kernel: cnn_forward.3
= control target key start
LH: loop header
LB: loop body
LE: loop exit
PB: predicated region body
PF: predicated region fallthrough
CT: control target
= control target key end

     0   :  { %10 = vsyncpa [#allocation4], 0  ;;  %s2193_s0 = inlined_call_operand.vmem [shape: bf16[8,9216], index: 0, kind: input, shape index: {}]   ;;  %s2194_s1 = inlined_call_operand.hbm [shape: bf16[9216,128], index: 1, kind: input, shape index: {}]   ;;  %s2195_s2 = inlined_call_operand.hbm [shape: f32[1,128], index: 2, kind: input, shape index: {}]   ;;  %s2196_s3 = inlined_call_operand.vmem [shape: bf16[128,10], index: 3, kind: input, shape index: {}]   ;;  %s2197_s4 = inlined_call_operand.hbm [shape: f32[1,10], index: 4, kind: input, shape index: {}]   ;;  %s2198_s5 = inlined_call_operand.vmem [shape: f32[8,10], index: 5, kind: output, shape index: {}]  }
   0x1   :  { %12 = vsyncpa [#allocation4 + $0x1], 0 }
   0x2   :  { %13 = vsyncpa [#allocation6], 0  ;;  %s1959_s18 = smov 0   ;;  %s1961_s19 = smov 0  }
   0x3   :  { %s1963_s20 = smov 0   ;;  %s1965_s21 = smov 0  }
   0x4   :  { %s1967_s22 = smov 0   ;;  %s1969_s23 = smov 0  }
   0x5 LB: > { %s1275_s24 = sadd.s32 4294967295, %s1922_s23   ;;  %s66_s25 = sadd.s32 1, %s1910_s20  ;;  %s1922_s23 = sphi %s1969_s23, %s19_s23   ;;  %s1918_s22 = sphi %s1967_s22, %s2208_s22   ;;  %s1914_s21 = sphi %s1965_s21, %s2207_s21   ;;  %s1910_s20 = sphi %s1963_s20, %s2206_s20   ;;  %s1906_s19 = sphi %s1961_s19, %s2205_s19   ;;  %s1902_s18 = sphi %s1959_s18, %s2204_s18  }
   0x6   : > { %p73_p0 = scmp.ne.s32.totalorder %s1910_s20, %s1906_s19  ;;  %p74_p1 = scmp.eq.s32.totalorder %s1922_s23, 0 }
   0x7   : > { %p79_p2 = scmp.ne.s32.totalorder %s1906_s19, %s1902_s18  ;;  %p1993_p3 = scmp.eq.s32.totalorder %s1275_s24, 0 }
   0x8   : > { %p1997_p4 = por %p74_p1, %p73_p0  ;;  %p1276_p5 = scmp.ge.s32.totalorder %s1922_s23, 1 }
   0x9   : > { %p2004_p6 = por %p1993_p3, %p79_p2  ;;  %p179_p7 = scmp.lt.s32.totalorder %s1922_s23, 9 }
   0xa   : > { %s191_s6 = sshll.u32 %s2195_s2, 4  ;;  %s1924_s8 = smov [#allocation5]   ;;  %s192_s6 = int_to_ptr.hbm [resolvable:$true] %s191_s6 }
   0xb   : > { %p2012_p8 = pnand %p1276_p5, %p179_p7  ;;  %s193_s9 = sshll.u32 %s1924_s8, 4  ;;  %s194_s9 = int_to_ptr.vmem [resolvable:$true] %s193_s9 }
   0xc   : > { %p1716_p10 = scmp.lt.s32.totalorder %s1922_s23, 8  ;;  %s206_s12 = sshll.u32 %s2197_s4, 4  ;;  %s207_s12 = int_to_ptr.hbm [resolvable:$true] %s206_s12 }
   0xd   : > { %p1703_p9 = pneg %p2012_p8  ;;  %s1925_s14 = smov [#allocation7]  }
   0xe   : > { %p2026_p12 = pnand %p1716_p10, %p1997_p4  ;;  %s208_s15 = sshll.u32 %s1925_s14, 4  ;;  %s209_s15 = int_to_ptr.vmem [resolvable:$true] %s208_s15 }
   0xf   : > { %p1704_p11 = pnand %p1703_p9, %p1993_p3  ;;  %s232_s16 = sand.u32 1, %s1910_s20  }
  0x10   : > { %s28_s17 = sadd.s32 1, %s1918_s22  ;;  %s1691_s18 = smul.u32 576, %s232_s16 }
  0x11   : > { %1706 = dma.hbm_to_vmem [thread:$0]  (!%p1704_p11), %s192_s6, 16, %s194_s9, [#allocation6]  }
  0x12   : > { %1709 = dma.hbm_to_vmem [thread:$0]  (!%p1704_p11), %s207_s12, 16, %s209_s15, [#allocation6]  }
  0x13   : > { %p29_p13 = scmp.ge.s32.totalorder %s28_s17, 8  ;;  %s1610_s24 = smul.u32 576, %s1918_s22 }
  0x14   : > { %s236_s9 = scalar_lea.vmem [#allocation3], %s1691_s18  ;;  %s233_s12 = scalar_lea.sflag [#allocation4], %s232_s16 }
  0x15   : > { %s2210_s17 = smov (%p29_p13, %s28_s17), 0  ;;  %s241_s30 = scalar_lea.hbm %s2194_s1, %s1610_s24 }
  0x16   : > { %s63_s6 = ssub.s32 %s1918_s22, %s2210_s17  ;;  %s242_s8 = sshll.u32 %s241_s30, 4  ;;  %s243_s8 = int_to_ptr.hbm [resolvable:$true] %s242_s8 }
  0x17   : > { %p64_p0 = scmp.eq.s32.totalorder %s63_s6, 0  ;;  %s244_s10 = sshll.u32 %s236_s9, 4  ;;  %s245_s10 = int_to_ptr.vmem [resolvable:$true] %s244_s10 }
  0x18   : > { %s1926_s14 = smov 64   ;;  %s1927_s15 = smov 4  }
  0x19   : > { %s2043_s11 = scalar_select %p64_p0, %s1910_s20, %s66_s25  }
  0x1a   : > { %1713 = dma.hbm_to_vmem [thread:$0]  (!%p2026_p12), %s243_s8, 9216, %s245_s10, %s233_s12, %s1926_s14, %s1926_s14, %s1927_s15  }
  0x1b   : > { %256 = sbr.rel (%p2012_p8) target bundleno = 691 (0x2b3), region = 40  ;;  %s258_s24 = sand.u32 (!%p2012_p8), 1, %s1906_s19  }
  0x1c   : > { %s1692_s27 = smul.u32 (!%p2012_p8), 576, %s258_s24  ;;  %s259_s29 = scalar_lea.sflag (!%p2012_p8), [#allocation4], %s258_s24 }
  0x1e   : > { %s2050_s30 = scalar_lea.vmem (!%p2012_p8), [#allocation3], %s1692_s27 }
  0x20   : > { %1893 = dma.done.wait (%p2004_p6), %s259_s29, 9216  }
  0x21   : > { %1895 = vsyncadd (%p2004_p6), %s259_s29, 4294958080 }
  0x22   : > { %1897 = dma.done.wait (%p1993_p3), [#allocation6], 32  }
  0x23   : > { %1899 = vsyncadd (%p1993_p3), [#allocation6], 4294967264  ;;  %s308_s25 = smul.u32 9, %s1914_s21  ;;  %p1285_p2 = scmp.ne.s32.totalorder %s1914_s21, 0 }
  0x25   : > { %p311_p1 = scmp.lt.s32.totalorder %s308_s25, 71  ;;  %326 = sbr.rel (%p1285_p2) target bundleno = 44 (0x2c), region = 56 }
  0x27   : > { %s2212_s25 = smov (!%p311_p1, %s308_s25), 71 }
  0x28   : > { %s1284_s7 = sshll.u32 %s2212_s25, 2 }
  0x29   : > { %s2064_s18 = scalar_lea.vmem %s2193_s0, %s1284_s7 }
  0x2a   : > { %v1928_v0 = vmov 0.0  }
  0x2b   : > { %327 = vst [vmem:[#allocation2] sm:$0xff] %v1928_v0 }
  0x2c PF: > { %v1618_v1 = vld [vmem:[%s2050_s30 + $0x38] sm:$0xff]  ;;  %v1617_v5 = vld [vmem:[%s2050_s30 + $0x30] sm:$0xff]  ;;  %v1616_v9 = vld [vmem:[%s2050_s30 + $0x28] sm:$0xff]  ;;  %p1574_p3 = scmp.ne.s32.totalorder %s1914_s21, 7 }
  0x2d   : > { %v1634_v2 = vld [vmem:[%s2050_s30 + $0xb8] sm:$0xff]  ;;  %942 = vmatpush.bf16.msra.mxu0 %v1618_v1  ;;  %v1633_v6 = vld [vmem:[%s2050_s30 + $0xb0] sm:$0xff]  ;;  %v1632_v10 = vld [vmem:[%s2050_s30 + $0xa8] sm:$0xff] }
  0x2e   : > { %v1642_v3 = vld [vmem:[%s2050_s30 + $0xf8] sm:$0xff]  ;;  %968 = vmatpush.bf16.msra.mxu2 %v1634_v2  ;;  %v1641_v7 = vld [vmem:[%s2050_s30 + $0xf0] sm:$0xff]  ;;  %v1640_v11 = vld [vmem:[%s2050_s30 + $0xe8] sm:$0xff] }
  0x2f   : > { %v1626_v4 = vld [vmem:[%s2050_s30 + $0x78] sm:$0xff]  ;;  %981 = vmatpush.bf16.msra.mxu3 %v1642_v3  ;;  %v1625_v8 = vld [vmem:[%s2050_s30 + $0x70] sm:$0xff]  ;;  %v1624_v12 = vld [vmem:[%s2050_s30 + $0x68] sm:$0xff] }
  0x30   : > { %955 = vmatpush.bf16.msra.mxu1 %v1626_v4  ;;  %v1615_v13 = vld [vmem:[%s2050_s30 + $0x20] sm:$0xff]  ;;  %v1614_v17 = vld [vmem:[%s2050_s30 + $0x18] sm:$0xff]  ;;  %v1613_v21 = vld [vmem:[%s2050_s30 + $0x10] sm:$0xff] }
  0x31   : > { %943 = vmatpush.bf16.msra.mxu0 %v1617_v5  ;;  %v1631_v14 = vld [vmem:[%s2050_s30 + $0xa0] sm:$0xff]  ;;  %v1630_v18 = vld [vmem:[%s2050_s30 + $0x98] sm:$0xff]  ;;  %v1629_v22 = vld [vmem:[%s2050_s30 + $0x90] sm:$0xff] }
  0x32   : > { %969 = vmatpush.bf16.msra.mxu2 %v1633_v6  ;;  %v1639_v15 = vld [vmem:[%s2050_s30 + $0xe0] sm:$0xff]  ;;  %v1638_v19 = vld [vmem:[%s2050_s30 + $0xd8] sm:$0xff]  ;;  %v1637_v23 = vld [vmem:[%s2050_s30 + $0xd0] sm:$0xff] }
  0x33   : > { %982 = vmatpush.bf16.msra.mxu3 %v1641_v7  ;;  %v1623_v16 = vld [vmem:[%s2050_s30 + $0x60] sm:$0xff]  ;;  %v1622_v20 = vld [vmem:[%s2050_s30 + $0x58] sm:$0xff]  ;;  %v1621_v24 = vld [vmem:[%s2050_s30 + $0x50] sm:$0xff] }
  0x34   : > { %956 = vmatpush.bf16.msra.mxu1 %v1625_v8  ;;  %v1612_v25 = vld [vmem:[%s2050_s30 + $0x8] sm:$0xff]  ;;  %v330_v29 = vld [vmem:[%s2064_s18 + $0x8] sm:$0xff]  ;;  %v329_v30 = vld [vmem:[%s2064_s18] sm:$0xff] }
  0x35   : > { %944 = vmatpush.bf16.msra.mxu0 %v1616_v9  ;;  %v1628_v26 = vld [vmem:[%s2050_s30 + $0x88] sm:$0xff]  ;;  %v1611_v31 = vld [vmem:[%s2050_s30] sm:$0xff]  ;;  %v485_v33 = vunpack.c.l.b16 %v330_v29  ;;  %v483_v34 = vunpack.c.l.b16 %v329_v30  ;;  %v1650_v35 = vld [vmem:[%s2050_s30 + $0x138] sm:$0xff]  ;;  %v486_v39 = vunpack.c.h.b16 %v330_v29  ;;  %v484_v40 = vunpack.c.h.b16 %v329_v30 }
  0x36   : > { %970 = vmatpush.bf16.msra.mxu2 %v1632_v10  ;;  %v1636_v27 = vld [vmem:[%s2050_s30 + $0xc8] sm:$0xff]  ;;  %v1627_v32 = vld [vmem:[%s2050_s30 + $0x80] sm:$0xff]  ;;  %v1666_v36 = vld [vmem:[%s2050_s30 + $0x1b8] sm:$0xff] }
  0x37   : > { %983 = vmatpush.bf16.msra.mxu3 %v1640_v11  ;;  %v1620_v28 = vld [vmem:[%s2050_s30 + $0x48] sm:$0xff]  ;;  %v1635_v37 = vld [vmem:[%s2050_s30 + $0xc0] sm:$0xff]  ;;  %v1674_v41 = vld [vmem:[%s2050_s30 + $0x1f8] sm:$0xff]  ;;  %v494_v43 = vpack.c.b16 %v485_v33, %v485_v33  ;;  %v492_v44 = vpack.c.b16 %v483_v34, %v483_v34  ;;  %v495_v47 = vpack.c.b16 %v486_v39, %v486_v39  ;;  %v493_v48 = vpack.c.b16 %v484_v40, %v484_v40 }
  0x38   : > { %957 = vmatpush.bf16.msra.mxu1 %v1624_v12  ;;  %v1619_v38 = vld [vmem:[%s2050_s30 + $0x40] sm:$0xff]  ;;  %v1658_v42 = vld [vmem:[%s2050_s30 + $0x178] sm:$0xff]  ;;  %v1649_v45 = vld [vmem:[%s2050_s30 + $0x130] sm:$0xff] }
  0x39   : > { %945 = vmatpush.bf16.msra.mxu0 %v1615_v13  ;;  %v1665_v46 = vld [vmem:[%s2050_s30 + $0x1b0] sm:$0xff]  ;;  %v1648_v51 = vld [vmem:[%s2050_s30 + $0x128] sm:$0xff]  ;;  %v1647_v55 = vld [vmem:[%s2050_s30 + $0x120] sm:$0xff] }
  0x3a   : > { %971 = vmatpush.bf16.msra.mxu2 %v1631_v14  ;;  %v1673_v49 = vld [vmem:[%s2050_s30 + $0x1f0] sm:$0xff]  ;;  %v1664_v52 = vld [vmem:[%s2050_s30 + $0x1a8] sm:$0xff]  ;;  %v1663_v56 = vld [vmem:[%s2050_s30 + $0x1a0] sm:$0xff] }
  0x3b   : > { %984 = vmatpush.bf16.msra.mxu3 %v1639_v15  ;;  %v1657_v50 = vld [vmem:[%s2050_s30 + $0x170] sm:$0xff]  ;;  %v1672_v53 = vld [vmem:[%s2050_s30 + $0x1e8] sm:$0xff]  ;;  %v1671_v57 = vld [vmem:[%s2050_s30 + $0x1e0] sm:$0xff] }
  0x3c   : > { %958 = vmatpush.bf16.msra.mxu1 %v1623_v16  ;;  %v1656_v54 = vld [vmem:[%s2050_s30 + $0x168] sm:$0xff]  ;;  %v1655_v58 = vld [vmem:[%s2050_s30 + $0x160] sm:$0xff]  ;;  %v1646_v59 = vld [vmem:[%s2050_s30 + $0x118] sm:$0xff] }
  0x3d   : > { %946 = vmatpush.bf16.msra.mxu0 %v1614_v17  ;;  %v1662_v60 = vld [vmem:[%s2050_s30 + $0x198] sm:$0xff]  ;;  %v1645_v63 = vld [vmem:[%s2050_s30 + $0x110] sm:$0xff]  ;;  %v1644_v3 = vld [vmem:[%s2050_s30 + $0x108] sm:$0xff] }
  0x3e   : > { %972 = vmatpush.bf16.msra.mxu2 %v1630_v18  ;;  %v1670_v61 = vld [vmem:[%s2050_s30 + $0x1d8] sm:$0xff]  ;;  %v1661_v0 = vld [vmem:[%s2050_s30 + $0x190] sm:$0xff]  ;;  %v1660_v4 = vld [vmem:[%s2050_s30 + $0x188] sm:$0xff] }
  0x3f   : > { %985 = vmatpush.bf16.msra.mxu3 %v1638_v19  ;;  %v1654_v62 = vld [vmem:[%s2050_s30 + $0x158] sm:$0xff]  ;;  %v1669_v1 = vld [vmem:[%s2050_s30 + $0x1d0] sm:$0xff]  ;;  %v331_v6 = vld [vmem:[%s2064_s18 + $0x10] sm:$0xff] }
  0x40   : > { %959 = vmatpush.bf16.msra.mxu1 %v1622_v20  ;;  %v1653_v2 = vld [vmem:[%s2050_s30 + $0x150] sm:$0xff]  ;;  %v1668_v7 = vld [vmem:[%s2050_s30 + $0x1c8] sm:$0xff]  ;;  %v487_v10 = vunpack.c.l.b16 %v331_v6  ;;  %v1643_v11 = vld [vmem:[%s2050_s30 + $0x100] sm:$0xff]  ;;  %v488_v17 = vunpack.c.h.b16 %v331_v6 }
  0x41   : > { %947 = vmatpush.bf16.msra.mxu0 %v1613_v21  ;;  %v332_v5 = vld [vmem:[%s2064_s18 + $0x18] sm:$0xff]  ;;  %v1652_v8 = vld [vmem:[%s2050_s30 + $0x148] sm:$0xff]  ;;  %v1659_v12 = vld [vmem:[%s2050_s30 + $0x180] sm:$0xff] }
  0x42   : > { %973 = vmatpush.bf16.msra.mxu2 %v1629_v22  ;;  %v489_v9 = vunpack.c.l.b16 %v332_v5  ;;  %v1682_v13 = vld [vmem:[%s2050_s30 + $0x238] sm:$0xff]  ;;  %v490_v14 = vunpack.c.h.b16 %v332_v5  ;;  %v1667_v15 = vld [vmem:[%s2050_s30 + $0x1c0] sm:$0xff]  ;;  %v496_v19 = vpack.c.b16 %v487_v10, %v487_v10  ;;  %v1681_v20 = vld [vmem:[%s2050_s30 + $0x230] sm:$0xff]  ;;  %v497_v22 = vpack.c.b16 %v488_v17, %v488_v17 }
  0x43   : > { %986 = vmatpush.bf16.msra.mxu3 %v1637_v23  ;;  %v1651_v16 = vld [vmem:[%s2050_s30 + $0x140] sm:$0xff]  ;;  %v1680_v23 = vld [vmem:[%s2050_s30 + $0x228] sm:$0xff] }
  0x44   : > { %960 = vmatpush.bf16.msra.mxu1 %v1621_v24  ;;  %v498_v18 = vpack.c.b16 %v489_v9, %v489_v9  ;;  %v499_v21 = vpack.c.b16 %v490_v14, %v490_v14  ;;  %v1679_v24 = vld [vmem:[%s2050_s30 + $0x220] sm:$0xff] }
  0x45   : > { %948 = vmatpush.bf16.msra.mxu0 %v1612_v25  ;;  %v1678_v25 = vld [vmem:[%s2050_s30 + $0x218] sm:$0xff]  ;;  %v1675_v30 = vld [vmem:[%s2050_s30 + $0x200] sm:$0xff] }
  0x46   : > { %974 = vmatpush.bf16.msra.mxu2 %v1628_v26  ;;  %v1677_v26 = vld [vmem:[%s2050_s30 + $0x210] sm:$0xff] }
  0x47   : > { %987 = vmatpush.bf16.msra.mxu3 %v1636_v27  ;;  %v1676_v27 = vld [vmem:[%s2050_s30 + $0x208] sm:$0xff] }
  0x48   : > { %961 = vmatpush.bf16.msra.mxu1 %v1620_v28  ;;  %v333_v28 = vld [vmem:[%s2064_s18 + $0x20] sm:$0xf] }
  0x49   : > { %949 = vmatpush.bf16.msra.mxu0 %v1611_v31  ;;  %v491_v29 = vunpack.c.l.b16 %v333_v28 }
  0x4a   : > { %975 = vmatpush.bf16.msra.mxu2 %v1627_v32 }
  0x4b   : > { %988 = vmatpush.bf16.msra.mxu3 %v1635_v37  ;;  %v500_v31 = vpack.c.b16 %v491_v29, %v491_v29 }
  0x4c   : > { %962 = vmatpush.bf16.msra.mxu1 %v1619_v38  ;;  %950 = vmatmul.bf16.vlgmr.msra.gmra.mxu0 %v492_v44 }
  0x4d   : > { %994 = vmatpush.bf16.msrb.mxu0 %v1650_v35  ;;  %976 = vmatmul.bf16.vlgmr.msra.gmra.mxu2 %v494_v43 }
  0x4e   : > { %1020 = vmatpush.bf16.msrb.mxu2 %v1666_v36  ;;  %989 = vmatmul.bf16.vlgmr.msra.gmra.mxu3 %v495_v47 }
  0x4f   : > { %1033 = vmatpush.bf16.msrb.mxu3 %v1674_v41  ;;  %963 = vmatmul.bf16.vlgmr.msra.gmra.mxu1 %v493_v48 }
  0x50   : > { %1007 = vmatpush.bf16.msrb.mxu1 %v1658_v42 }
  0x51   : > { %995 = vmatpush.bf16.msrb.mxu0 %v1649_v45 }
  0x52   : > { %1021 = vmatpush.bf16.msrb.mxu2 %v1665_v46 }
  0x53   : > { %1034 = vmatpush.bf16.msrb.mxu3 %v1673_v49 }
  0x54   : > { %1008 = vmatpush.bf16.msrb.mxu1 %v1657_v50 }
  0x55   : > { %996 = vmatpush.bf16.msrb.mxu0 %v1648_v51 }
  0x56   : > { %1022 = vmatpush.bf16.msrb.mxu2 %v1664_v52 }
  0x57   : > { %1035 = vmatpush.bf16.msrb.mxu3 %v1672_v53 }
  0x58   : > { %1009 = vmatpush.bf16.msrb.mxu1 %v1656_v54 }
  0x59   : > { %997 = vmatpush.bf16.msrb.mxu0 %v1647_v55  ;;  %v328_v55 = vld [vmem:[#allocation2] sm:$0xff] }
  0x5a   : > { %1023 = vmatpush.bf16.msrb.mxu2 %v1663_v56 }
  0x5b   : > { %1036 = vmatpush.bf16.msrb.mxu3 %v1671_v57 }
  0x5c   : > { %1010 = vmatpush.bf16.msrb.mxu1 %v1655_v58 }
  0x5d   : > { %998 = vmatpush.bf16.msrb.mxu0 %v1646_v59 }
  0x5e   : > { %1024 = vmatpush.bf16.msrb.mxu2 %v1662_v60 }
  0x5f   : > { %1037 = vmatpush.bf16.msrb.mxu3 %v1670_v61 }
  0x60   : > { %1011 = vmatpush.bf16.msrb.mxu1 %v1654_v62 }
  0x61   : > { %999 = vmatpush.bf16.msrb.mxu0 %v1645_v63 }
  0x62   : > { %1025 = vmatpush.bf16.msrb.mxu2 %v1661_v0 }
  0x63   : > { %1038 = vmatpush.bf16.msrb.mxu3 %v1669_v1 }
  0x64   : > { %1012 = vmatpush.bf16.msrb.mxu1 %v1653_v2 }
  0x65   : > { %1000 = vmatpush.bf16.msrb.mxu0 %v1644_v3 }
  0x66   : > { %1026 = vmatpush.bf16.msrb.mxu2 %v1660_v4 }
  0x67   : > { %1039 = vmatpush.bf16.msrb.mxu3 %v1668_v7 }
  0x68   : > { %1013 = vmatpush.bf16.msrb.mxu1 %v1652_v8 }
  0x69   : > { %1001 = vmatpush.bf16.msrb.mxu0 %v1643_v11 }
  0x6a   : > { %1027 = vmatpush.bf16.msrb.mxu2 %v1659_v12 }
  0x6b   : > { %1040 = vmatpush.bf16.msrb.mxu3 %v1667_v15 }
  0x6c   : > { %1014 = vmatpush.bf16.msrb.mxu1 %v1651_v16  ;;  %1002 = vmatmul.bf16.vlgmr.msrb.gmra.mxu0 %v496_v19 }
  0x6d   : > { %1046 = vmatpush.bf16.msra.mxu0 %v1682_v13  ;;  %1028 = vmatmul.bf16.vlgmr.msrb.gmra.mxu2 %v498_v18 }
  0x6e   : > { %1041 = vmatmul.bf16.vlgmr.msrb.gmra.mxu3 %v499_v21 }
  0x6f   : > { %1015 = vmatmul.bf16.vlgmr.msrb.gmra.mxu1 %v497_v22 }
  0x71   : > { %1047 = vmatpush.bf16.msra.mxu0 %v1681_v20 }
  0x75   : > { %1048 = vmatpush.bf16.msra.mxu0 %v1680_v23 }
  0x79   : > { %1049 = vmatpush.bf16.msra.mxu0 %v1679_v24 }
  0x7d   : > { %1050 = vmatpush.bf16.msra.mxu0 %v1678_v25 }
  0x81   : > { %1051 = vmatpush.bf16.msra.mxu0 %v1677_v26 }
  0x85   : > { %1052 = vmatpush.bf16.msra.mxu0 %v1676_v27 }
  0x89   : > { %1053 = vmatpush.bf16.msra.mxu0 %v1675_v30 }
  0x8c   : > { %1054 = vmatmul.bf16.vlgmr.msra.gmra.mxu0 %v500_v31 }
  0xc9   : > { %v951_v32 = vpop.f32.mrf.mxu0 }
  0xcc   : > { %v964_v33 = vpop.f32.mrf.mxu1 }
  0xcd   : > { %v965_v42 = vadd.f32 %v964_v33, %v951_v32 }
  0xd0   : > { %v977_v34 = vpop.f32.mrf.mxu2 }
  0xd1   : > { %v990_v35 = vpop.f32.mrf.mxu3  ;;  %v953_v36 = vpop.f32.mrf.mxu0  ;;  %v978_v44 = vadd.f32 %v977_v34, %v965_v42 }
  0xd3   : > { %v991_v48 = vadd.f32 %v990_v35, %v978_v44 }
  0xd4   : > { %v966_v37 = vpop.f32.mrf.mxu1 }
  0xd8   : > { %v979_v38 = vpop.f32.mrf.mxu2 }
  0xd9   : > { %v992_v39 = vpop.f32.mrf.mxu3 }
  0xe9   : > { %v1003_v40 = vpop.f32.mrf.mxu0 }
  0xea   : > { %v1004_v50 = vadd.f32 %v1003_v40, %v991_v48 }
  0xec   : > { %v1016_v41 = vpop.f32.mrf.mxu1 }
  0xed   : > { %v1017_v52 = vadd.f32 %v1016_v41, %v1004_v50 }
  0xf0   : > { %v1029_v43 = vpop.f32.mrf.mxu2 }
  0xf1   : > { %v1042_v45 = vpop.f32.mrf.mxu3  ;;  %v1005_v46 = vpop.f32.mrf.mxu0  ;;  %v1030_v53 = vadd.f32 %v1029_v43, %v1017_v52 }
  0xf3   : > { %v1043_v54 = vadd.f32 %v1042_v45, %v1030_v53 }
  0xf4   : > { %v1018_v47 = vpop.f32.mrf.mxu1 }
  0xf8   : > { %v1031_v49 = vpop.f32.mrf.mxu2 }
  0xf9   : > { %v1044_v51 = vpop.f32.mrf.mxu3 }
 0x109   : > { %v1055_v56 = vpop.f32.mrf.mxu0 }
 0x10a   : > { %v1056_v57 = vadd.f32 %v1055_v56, %v1043_v54 }
 0x10c   : > { %v1059_v58 = vadd.f32 %v1056_v57, %v328_v55 }
 0x10d   : > { %1064 = sbr.rel (%p1574_p3) target bundleno = 691 (0x2b3), region = 60 }
 0x10e   : > { %1060 = vst [vmem:[#allocation2] sm:$0xff] %v1059_v58 }
 0x111   : > { %v1057_v59 = vpop.f32.mrf.mxu0 }
 0x112   : > { %v1690_v60 = vld [vmem:[%s2196_s3 + $0x38] sm:$0xff]  ;;  %v1689_v61 = vld [vmem:[%s2196_s3 + $0x30] sm:$0xff]  ;;  %v1688_v62 = vld [vmem:[%s2196_s3 + $0x28] sm:$0xff]  ;;  %vm1154_vm0 = vcmask 80896  }
 0x113   : > { %1141 = vmatpush.bf16.msra.mxu0 %v1690_v60  ;;  %v1687_v63 = vld [vmem:[%s2196_s3 + $0x20] sm:$0xff]  ;;  %v1686_v0 = vld [vmem:[%s2196_s3 + $0x18] sm:$0xff]  ;;  %v1772_v1 = vld [vmem:[#allocation5] ss:$0 sm:$0xff] }
 0x114   : > { %v1685_v2 = vld [vmem:[%s2196_s3 + $0x10] sm:$0xff]  ;;  %v1684_v5 = vld [vmem:[%s2196_s3 + $0x8] sm:$0xff]  ;;  %v1683_v7 = vld [vmem:[%s2196_s3] sm:$0xff] }
 0x115   : > { %v1065_v3 = vld [vmem:[#allocation2] sm:$0xff]  ;;  %v1773_v9 = vld [vmem:[#allocation7] ss:$0 sm:$0xff] }
 0x116   : > { %v1070_v4 = vadd.f32 %v1772_v1, %v1065_v3 }
 0x117   : > { %1142 = vmatpush.bf16.msra.mxu0 %v1689_v61 }
 0x118   : > { %v1071_v6 = vmax.f32 %v1070_v4, 0.0 }
 0x11a   : > { %v1072_v8 = vpack.c.bf16 %v1071_v6, %v1071_v6 }
 0x11b   : > { %1143 = vmatpush.bf16.msra.mxu0 %v1688_v62 }
 0x11f   : > { %1144 = vmatpush.bf16.msra.mxu0 %v1687_v63 }
 0x123   : > { %1145 = vmatpush.bf16.msra.mxu0 %v1686_v0 }
 0x127   : > { %1146 = vmatpush.bf16.msra.mxu0 %v1685_v2 }
 0x12b   : > { %1147 = vmatpush.bf16.msra.mxu0 %v1684_v5 }
 0x12f   : > { %1148 = vmatpush.bf16.msra.mxu0 %v1683_v7 }
 0x132   : > { %1149 = vmatmul.bf16.vlgmr.msra.gmra.mxu0 %v1072_v8 }
 0x1af   : > { %v1150_v10 = vpop.f32.mrf.mxu0 }
 0x1b0   : > { %v1151_v11 = vadd.f32 %v1773_v9, %v1150_v10 }
 0x1b2   : > { %v1155_v12 = vsel %vm1154_vm0, %v1151_v11, -inf }
 0x1b3   : > { %1156 = vmax.xlane.f32.xlu0 %v1155_v12 }
 0x1b7   : > { %v1152_v13 = vpop.f32.mrf.mxu0 }
 0x226   : > { %v1157_v14 = vpop.xlane.xlu0 %1156 }
 0x227   : > { %v1158_v15 = vsub.f32 %v1151_v11, %v1157_v14 }
 0x229   : > { %v1159_v16 = vmul.f32 1.442695, %v1158_v15 }
 0x22b   : > { %1774 = vpow2.f32 %v1159_v16 }
 0x231   : > { %v1775_v17 = vpop.eup %1774 }
 0x232   : > { %v1161_v18 = vsel %vm1154_vm0, %v1775_v17, 0.0 }
 0x233   : > { %1162 = vadd.xlane.f32.xlu0 %v1161_v18 }
 0x2a6   : > { %v1163_v19 = vpop.xlane.xlu0 %1162 }
 0x2a7   : > { %1776 = vlog2.f32 %v1163_v19 }
 0x2ad   : > { %v1777_v20 = vpop.eup %1776 }
 0x2ae   : > { %v1165_v21 = vmul.f32 0.6931472, %v1777_v20 }
 0x2b0   : > { %v1166_v22 = vsub.f32 %v1158_v15, %v1165_v21 }
 0x2b2   : > { %1167 = vst.msk [vmem:[%s2198_s5] sm:$0xff] %vm1154_vm0, %v1166_v22 }
 0x2b3 PF: > { %s19_s23 = sadd.s32 1, %s1922_s23   ;;  %s2204_s18 = smov %s1906_s19 }
 0x2b4   : > { %p16_p4 = scmp.ge.s32.totalorder %s19_s23, 10   ;;  %s2205_s19 = smov %s1910_s20 }
 0x2b5   : > { %s2206_s20 = smov %s2043_s11  ;;  %s2207_s21 = smov %s1918_s22 }
 0x2b6   : > { %s2208_s22 = smov %s2210_s17  ;;  %18 = sbr.rel (!%p16_p4) target bundleno = 5 (0x5), region = 99 }
 0x2bb   :  { %1187 = vsyncpa [#allocation4], 1 }
 0x2bc   :  { %1189 = vsyncpa [#allocation4 + $0x1], 1 }
 0x2bd   :  { %1190 = vsyncpa [#allocation6], 1 }

// kernel: cnn_forward.2
= control target key start
LH: loop header
LB: loop body
LE: loop exit
PB: predicated region body
PF: predicated region fallthrough
CT: control target
= control target key end

     0   :  { %s2629_s18 = smov 0   ;;  %s3460_s0 = inlined_call_operand.vmem [shape: f32[2,28,28], index: 0, kind: input, shape index: {}]   ;;  %s3461_s1 = inlined_call_operand.vmem [shape: f32[32,9], index: 1, kind: input, shape index: {}]   ;;  %s3462_s2 = inlined_call_operand.vmem [shape: f32[32,1], index: 2, kind: input, shape index: {}]   ;;  %s3463_s3 = inlined_call_operand.vmem [shape: bf16[9,64,32], index: 3, kind: input, shape index: {}]   ;;  %s3464_s4 = inlined_call_operand.vmem [shape: f32[64,1], index: 4, kind: input, shape index: {}]   ;;  %s3465_s5 = inlined_call_operand.vmem [shape: bf16[2,12,64,12], index: 5, kind: output, shape index: {}]  }
   0x1 LB: > { %s2057_s19 = sadd.s32 4294967295, %s2574_s18   ;;  %p2061_p0 = scmp.ge.s32.totalorder %s2574_s18, 1  ;;  %s2574_s18 = sphi %s2629_s18, %s15_s18  }
   0x2   : > { %p187_p1 = scmp.lt.s32.totalorder %s2574_s18, 3 }
   0x4   : > { %p188_p2 = pnand %p2061_p0, %p187_p1 }
   0x5   : > { %p215_p3 = scmp.lt.s32.totalorder (!%p188_p2), %s2057_s19, 1  ;;  %s2647_s28 = smov (!%p188_p2), 0  }
   0x6   : > { %191 = sbr.rel (%p188_p2) target bundleno = 1198 (0x4ae), region = 40 }
   0xb   : > { %s3499_s19 = smov (!%p215_p3, %s2057_s19), 1 }
   0xc   : > { %s2434_s20 = sshll.u32 %s3499_s19, 5  ;;  %s2486_s21 = smul.u32 384, %s3499_s19 }
   0xd   : > { %s2640_s24 = scalar_lea.vmem %s3460_s0, %s2434_s20 }
   0xe   : > { %s2645_s27 = scalar_lea.vmem %s3465_s5, %s2486_s21 }
   0xf LB: >> { %v2655_v0 = vld [vmem:[%s3461_s1 + $0x10] sm:$0xff]  ;;  %v2660_v1 = vld [vmem:[%s3461_s1] sm:$0xff]  ;;  %v2584_v2 = vmov 1   ;;  %v2585_v3 = vmov 0   ;;  %s2666_s8 = scalar_lea.vmem %s2640_s24, %s2578_s28  ;;  %v2673_v4 = vld [vmem:[%s3461_s1 + $0x18] sm:$0xff]  ;;  %v2586_v6 = vmov 2   ;;  %s2578_s28 = sphi %s2647_s28, %s231_s28  }
  0x10   : >> { %2528 = vset.pattern.permute.xlu0 %v2584_v2  ;;  %2527 = vset.pattern.permute.xlu2 %v2584_v2  ;;  %v2678_v5 = vld [vmem:[%s3461_s1 + $0x8] sm:$0xff]  ;;  %v2587_v7 = vmov 3   ;;  %v2588_v8 = vmov 4   ;;  %v2589_v9 = vmov 5   ;;  %v2700_v10 = vld [vmem:[%s2666_s8] ss:$0 sm:$0xff] }
  0x11   : >> { %2526 = vset.pattern.permute.xlu1 %v2585_v3  ;;  %276 = vperm.xlu0 %2528, %v2655_v0   ;;  %s2590_s13 = smov 127   ;;  %s2591_s14 = smov 126   ;;  %v2713_v21 = vld [vmem:[%s2666_s8 + $0x1] ss:$0 sm:$0xff]  ;;  %v2592_v29 = vmov 6   ;;  %v2593_v41 = vmov 7  }
  0x12   : >> { %250 = vperm.xlu1 %2526, %v2655_v0   ;;  %268 = vperm.xlu2 %2527, %v2660_v1   ;;  %v2594_v45 = vmov 8   ;;  %s2435_s25 = sshll.u32 %s2578_s28, 4  ;;  %vm602_vm0 = vcmask 207872   ;;  %s231_s28 = sadd.s32 1, %s2578_s28  }
  0x13   : >> { %s601_s26 = scalar_lea.vmem [#allocation2], %s2435_s25  ;;  %p228_p4 = scmp.ge.s32.totalorder %s231_s28, 26  }
  0x14   : > { %s2852_s24 = smov (%p228_p4), 0  }
  0x19   : >> { %2532 = vset.pattern.permute.xlu0 %v2586_v6 }
  0x1a   : >> { %255 = vperm.xlu1 %2526, %v2673_v4   ;;  %272 = vperm.xlu2 %2527, %v2678_v5  }
  0x1b   : >> { %316 = vperm.xlu0 %2532, %v2655_v0  }
  0x22   : >> { %2529 = vset.pattern.permute.xlu1 %v2584_v2  ;;  %2531 = vset.pattern.permute.xlu2 %v2586_v6 }
  0x23   : >> { %280 = vperm.xlu1 %2529, %v2673_v4   ;;  %312 = vperm.xlu2 %2531, %v2678_v5  }
  0x24   : >> { %2535 = vset.pattern.permute.xlu0 %v2587_v7 }
  0x25   : >> { %359 = vperm.xlu0 %2535, %v2655_v0  }
  0x2b   : >> { %2530 = vset.pattern.permute.xlu1 %v2586_v6  ;;  %2534 = vset.pattern.permute.xlu2 %v2587_v7 }
  0x2c   : >> { %308 = vperm.xlu1 %2530, %v2660_v1   ;;  %355 = vperm.xlu2 %2534, %v2678_v5  }
  0x2d   : >> { %2538 = vset.pattern.permute.xlu0 %v2588_v8 }
  0x2e   : >> { %388 = vperm.xlu0 %2538, %v2673_v4  }
  0x34   : >> { %320 = vperm.xlu1 %2530, %v2673_v4   ;;  %2536 = vset.pattern.permute.xlu2 %v2588_v8 }
  0x35   : >> { %376 = vperm.xlu2 %2536, %v2660_v1  }
  0x36   : >> { %2539 = vset.pattern.permute.xlu0 %v2589_v9 }
  0x37   : >> { %416 = vperm.xlu0 %2539, %v2660_v1  }
  0x3c   : >> { %2533 = vset.pattern.permute.xlu1 %v2587_v7 }
  0x3d   : >> { %351 = vperm.xlu1 %2533, %v2660_v1   ;;  %384 = vperm.xlu2 %2536, %v2655_v0  }
  0x3f   : >> { %2542 = vset.pattern.permute.xlu0 %v2592_v29 }
  0x45   : >> { %363 = vperm.xlu1 %2533, %v2673_v4   ;;  %2541 = vset.pattern.permute.xlu2 %v2589_v9 }
  0x46   : >> { %424 = vperm.xlu2 %2541, %v2655_v0  }
  0x4d   : >> { %2537 = vset.pattern.permute.xlu1 %v2588_v8 }
  0x4e   : >> { %380 = vperm.xlu1 %2537, %v2678_v5   ;;  %2544 = vset.pattern.permute.xlu2 %v2592_v29 }
  0x56   : >> { %2540 = vset.pattern.permute.xlu1 %v2589_v9 }
  0x57   : >> { %420 = vperm.xlu1 %2540, %v2678_v5  }
  0x5f   : >> { %428 = vperm.xlu1 %2540, %v2673_v4  }
  0x67   : >> { %2543 = vset.pattern.permute.xlu1 %v2592_v29 }
  0x6c   : >> { %v269_v11 = vpop.permute.xlu2 %268 }
  0x6d   : >> { %v283_v12 = vmul.f32 %v2700_v10, %v269_v11 }
  0x6f   : >> { %291 = vrot.lane.b32.xlu2 %v283_v12, %s2590_s13 }
  0x74   : >> { %v273_v13 = vpop.permute.xlu2 %272 }
  0x75   : >> { %v284_v14 = vmul.f32 %v2700_v10, %v273_v13  ;;  %v2556_v13 = vld [vmem:[%s2666_s8 + $0x2] ss:$0 sm:$0xff] }
  0x77   : >> { %293 = vrot.lane.b32.xlu1 %v284_v14, %s2590_s13 }
  0x7d   : >> { %v313_v15 = vpop.permute.xlu2 %312 }
  0x7e   : >> { %v324_v16 = vmul.f32 %v2700_v10, %v313_v15 }
  0x80   : >> { %333 = vrot.lane.b32.xlu1 %v324_v16, %s2591_s14 }
  0x83   : >> { %v277_v17 = vpop.permute.xlu0 %276 }
  0x84   : >> { %v285_v18 = vmul.f32 %v2700_v10, %v277_v17  ;;  %v251_v19 = vpop.permute.xlu1 %250 }
  0x85   : >> { %v261_v54 = vmul.f32 %v2700_v10, %v251_v19 }
  0x86   : >> { %v2709_v20 = vpop.permute.xlu2 %355  ;;  %295 = vrot.lane.b32.xlu2 %v285_v18, %s2590_s13 }
  0x8c   : >> { %v2715_v22 = vpop.permute.xlu1 %255 }
  0x8d   : >> { %v317_v34 = vpop.permute.xlu0 %316 }
  0x8e   : >> { %v325_v35 = vmul.f32 %v2700_v10, %v317_v34 }
  0x8f   : >> { %v377_v23 = vpop.permute.xlu2 %376 }
  0x90   : >> { %v391_v24 = vmul.f32 %v2713_v21, %v377_v23 }
  0x92   : >> { %399 = vrot.lane.b32.xlu1 %v391_v24, %s2590_s13 }
  0x95   : >> { %v281_v25 = vpop.permute.xlu1 %280 }
  0x96   : >> { %v286_v26 = vmul.f32 %v2700_v10, %v281_v25 }
  0x97   : >> { %v385_v27 = vpop.permute.xlu2 %384  ;;  %v360_v40 = vpop.permute.xlu0 %359 }
  0x98   : >> { %v393_v28 = vmul.f32 %v2713_v21, %v385_v27  ;;  %297 = vrot.lane.b32.xlu0 %v286_v26, %s2590_s13  ;;  %v369_v61 = vmul.f32 %v2713_v21, %v360_v40 }
  0x9a   : >> { %403 = vrot.lane.b32.xlu1 %v393_v28, %s2590_s13 }
  0x9e   : >> { %v309_v30 = vpop.permute.xlu1 %308 }
  0x9f   : >> { %v323_v31 = vmul.f32 %v2700_v10, %v309_v30 }
  0xa0   : >> { %v425_v32 = vpop.permute.xlu2 %424  ;;  %v389_v44 = vpop.permute.xlu0 %388 }
  0xa1   : >> { %v433_v33 = vmul.f32 %v2713_v21, %v425_v32  ;;  %331 = vrot.lane.b32.xlu2 %v323_v31, %s2591_s14  ;;  %v394_v46 = vmul.f32 %v2713_v21, %v389_v44 }
  0xa3   : >> { %443 = vrot.lane.b32.xlu1 %v433_v33, %s2591_s14 }
  0xa6   : >> { %v321_v36 = vpop.permute.xlu1 %320 }
  0xa7   : >> { %v326_v37 = vmul.f32 %v2700_v10, %v321_v36 }
  0xa9   : >> { %337 = vrot.lane.b32.xlu0 %v326_v37, %s2591_s14  ;;  %335 = vrot.lane.b32.xlu2 %v325_v35, %s2591_s14  ;;  %v417_v49 = vpop.permute.xlu0 %416 }
  0xaa   : >> { %v431_v50 = vmul.f32 %v2713_v21, %v417_v49  ;;  %v563_v49 = vld [vmem:[%s3462_s2] sm:$0xff] }
  0xab   : >> { %463 = vperm.xlu1 %2543, %v2678_v5  }
  0xaf   : >> { %v2732_v38 = vpop.permute.xlu1 %351 }
  0xb3   : >> { %471 = vperm.xlu1 %2543, %v2673_v4  }
  0xb7   : >> { %v364_v39 = vpop.permute.xlu1 %363 }
  0xb8   : >> { %v370_v11 = vmul.f32 %v2713_v21, %v364_v39 }
  0xbb   : >> { %2547 = vset.pattern.permute.xlu1 %v2593_v41 }
  0xbc   : >> { %492 = vperm.xlu1 %2547, %v2655_v0  }
  0xc0   : >> { %v381_v42 = vpop.permute.xlu1 %380 }
  0xc1   : >> { %v392_v43 = vmul.f32 %v2713_v21, %v381_v42 }
  0xc3   : >> { %401 = vrot.lane.b32.xlu2 %v392_v43, %s2590_s13 }
  0xc4   : >> { %2548 = vset.pattern.permute.xlu1 %v2594_v45 }
  0xc5   : >> { %524 = vperm.xlu1 %2548, %v2660_v1  }
  0xc9   : >> { %v421_v47 = vpop.permute.xlu1 %420  ;;  %v2748_v52 = vpop.permute.xlu2 %291 }
  0xca   : >> { %v432_v48 = vmul.f32 %v2713_v21, %v421_v47 }
  0xcb   : >> { %405 = vrot.lane.b32.xlu2 %v394_v46, %s2590_s13 }
  0xcc   : >> { %441 = vrot.lane.b32.xlu0 %v432_v48, %s2591_s14 }
  0xcd   : >> { %536 = vperm.xlu1 %2548, %v2673_v4  }
  0xd1   : >> { %v429_v51 = vpop.permute.xlu1 %428 }
  0xd2   : >> { %v434_v53 = vmul.f32 %v2713_v21, %v429_v51  ;;  %v564_v51 = vld [vmem:[%s3462_s2 + $0x8] sm:$0xff] }
  0xd3   : >> { %439 = vrot.lane.b32.xlu2 %v431_v50, %s2591_s14 }
  0xd4   : >> { %459 = vperm.xlu0 %2542, %v2660_v1  }
  0xd5   : >> { %2553 = vset.pattern.permute.xlu1 %v2585_v3 }
  0xdb   : >> { %445 = vrot.lane.b32.xlu2 %v434_v53, %s2591_s14 }
  0xdc   : >> { %2546 = vset.pattern.permute.xlu0 %v2593_v41 }
  0xdd   : >> { %488 = vperm.xlu0 %2546, %v2678_v5  }
  0xe0   : >> { %v296_v55 = vpop.permute.xlu2 %295 }
  0xe1   : >> { %v305_v56 = vadd.f32 %v296_v55, %v261_v54 }
  0xe3   : >> { %467 = vperm.xlu2 %2544, %v2655_v0  }
  0xe5   : >> { %2550 = vset.pattern.permute.xlu0 %v2594_v45 }
  0xe6   : >> { %532 = vperm.xlu0 %2550, %v2655_v0  }
  0xe9   : >> { %v2759_v57 = vpop.permute.xlu1 %293 }
  0xeb   : >> { %2545 = vset.pattern.permute.xlu2 %v2593_v41 }
  0xec   : >> { %484 = vperm.xlu2 %2545, %v2660_v1  }
  0xee   : >> { %2551 = vset.pattern.permute.xlu0 %v2585_v3 }
  0xef   : >> { %240 = vperm.xlu0 %2551, %v2660_v1   ;;  %v262_v1 = vmul.f32 %v2700_v10, %v2715_v22 }
  0xf2   : >> { %v2763_v58 = vpop.permute.xlu1 %333 }
  0xf4   : >> { %496 = vperm.xlu2 %2545, %v2673_v4  }
  0xf7   : >> { %245 = vperm.xlu0 %2551, %v2678_v5  }
  0xfb   : >> { %v2765_v59 = vpop.permute.xlu2 %331 }
  0xfc   : >> { %2549 = vset.pattern.permute.xlu2 %v2594_v45 }
  0xfd   : >> { %528 = vperm.xlu2 %2549, %v2678_v5  }
 0x103   : >> { %v336_v60 = vpop.permute.xlu2 %335 }
 0x104   : >> { %v345_v62 = vadd.f32 %v336_v60, %v305_v56  ;;  %v2769_v63 = vpop.permute.xlu1 %399  ;;  %v367_v56 = vmul.f32 %v2713_v21, %v2732_v38 }
 0x105   : >> { %2552 = vset.pattern.permute.xlu2 %v2585_v3 }
 0x106   : >> { %v373_v0 = vadd.f32 %v369_v61, %v345_v62  ;;  %v565_v61 = vld [vmem:[%s3462_s2 + $0x10] sm:$0xff]  ;;  %v566_v62 = vld [vmem:[%s3462_s2 + $0x18] sm:$0xff] }
 0x10a   : >> { %v298_v2 = vpop.permute.xlu0 %297 }
 0x10b   : >> { %v306_v4 = vadd.f32 %v298_v2, %v262_v1 }
 0x10c   : >> { %v404_v6 = vpop.permute.xlu1 %403 }
 0x10d   : >> { %v413_v7 = vadd.f32 %v404_v6, %v373_v0 }
 0x115   : >> { %v444_v8 = vpop.permute.xlu1 %443 }
 0x116   : >> { %v453_v9 = vadd.f32 %v444_v8, %v413_v7 }
 0x11b   : >> { %v338_v5 = vpop.permute.xlu0 %337 }
 0x11c   : >> { %v346_v12 = vadd.f32 %v338_v5, %v306_v4 }
 0x11d   : >> { %v2776_v14 = vpop.permute.xlu2 %401  ;;  %v464_v15 = vpop.permute.xlu1 %463 }
 0x11e   : >> { %v374_v16 = vadd.f32 %v370_v11, %v346_v12  ;;  %v2778_v3 = vmul.f32 %v2556_v13, %v464_v15 }
 0x125   : >> { %v406_v17 = vpop.permute.xlu2 %405  ;;  %v472_v18 = vpop.permute.xlu1 %471 }
 0x126   : >> { %v414_v19 = vadd.f32 %v406_v17, %v374_v16  ;;  %v478_v22 = vmul.f32 %v2556_v13, %v472_v18 }
 0x12d   : >> { %v440_v23 = vpop.permute.xlu2 %439 }
 0x12e   : >> { %v493_v35 = vpop.permute.xlu1 %492 }
 0x12f   : >> { %v501_v36 = vmul.f32 %v2556_v13, %v493_v35 }
 0x135   : >> { %v446_v24 = vpop.permute.xlu2 %445 }
 0x136   : >> { %v454_v25 = vadd.f32 %v446_v24, %v414_v19 }
 0x137   : >> { %v525_v42 = vpop.permute.xlu1 %524 }
 0x138   : >> { %v2780_v26 = vadd.f32 %v478_v22, %v454_v25  ;;  %v539_v43 = vmul.f32 %v2556_v13, %v525_v42 }
 0x13d   : >> { %v468_v27 = vpop.permute.xlu2 %467 }
 0x13e   : >> { %v477_v28 = vmul.f32 %v2556_v13, %v468_v27  ;;  %v442_v29 = vpop.permute.xlu0 %441 }
 0x13f   : >> { %v537_v48 = vpop.permute.xlu1 %536 }
 0x140   : >> { %v2782_v30 = vadd.f32 %v477_v28, %v453_v9  ;;  %v542_v50 = vmul.f32 %v2556_v13, %v537_v48 }
 0x146   : >> { %v460_v31 = vpop.permute.xlu0 %459  ;;  %v485_v32 = vpop.permute.xlu2 %484 }
 0x147   : >> { %v475_v33 = vmul.f32 %v2556_v13, %v460_v31  ;;  %v499_v34 = vmul.f32 %v2556_v13, %v485_v32 }
 0x149   : >> { %507 = vrot.lane.b32.xlu2 %v499_v34, %s2590_s13 }
 0x14e   : >> { %v497_v37 = vpop.permute.xlu2 %496 }
 0x14f   : >> { %v502_v39 = vmul.f32 %v2556_v13, %v497_v37  ;;  %v489_v40 = vpop.permute.xlu0 %488 }
 0x150   : >> { %v500_v41 = vmul.f32 %v2556_v13, %v489_v40 }
 0x151   : >> { %511 = vrot.lane.b32.xlu2 %v501_v36, %s2590_s13  ;;  %513 = vrot.lane.b32.xlu0 %v502_v39, %s2590_s13 }
 0x152   : >> { %509 = vrot.lane.b32.xlu1 %v500_v41, %s2590_s13 }
 0x157   : >> { %v529_v44 = vpop.permute.xlu2 %528 }
 0x158   : >> { %v533_v45 = vpop.permute.xlu0 %532  ;;  %v540_v46 = vmul.f32 %v2556_v13, %v529_v44 }
 0x159   : >> { %v541_v47 = vmul.f32 %v2556_v13, %v533_v45 }
 0x15a   : >> { %547 = vrot.lane.b32.xlu1 %v539_v43, %s2591_s14  ;;  %549 = vrot.lane.b32.xlu2 %v540_v46, %s2591_s14 }
 0x15b   : >> { %551 = vrot.lane.b32.xlu0 %v541_v47, %s2591_s14 }
 0x161   : >> { %v241_v53 = vpop.permute.xlu0 %240 }
 0x162   : >> { %v259_v54 = vmul.f32 %v2700_v10, %v241_v53  ;;  %553 = vrot.lane.b32.xlu1 %v542_v50, %s2591_s14  ;;  %569 = vperm.xlu2 %2552, %v563_v49  }
 0x163   : >> { %574 = vperm.xlu0 %2551, %v564_v51  }
 0x164   : >> { %v303_v55 = vadd.f32 %v2748_v52, %v259_v54 }
 0x166   : >> { %v343_v60 = vadd.f32 %v2765_v59, %v303_v55  ;;  %v368_v59 = vmul.f32 %v2713_v21, %v2709_v20 }
 0x168   : >> { %v371_v0 = vadd.f32 %v367_v56, %v343_v60 }
 0x169   : >> { %v246_v1 = vpop.permute.xlu0 %245 }
 0x16a   : >> { %v260_v2 = vmul.f32 %v2700_v10, %v246_v1  ;;  %579 = vperm.xlu1 %2553, %v565_v61   ;;  %584 = vperm.xlu2 %2552, %v566_v62   ;;  %v411_v52 = vadd.f32 %v2769_v63, %v371_v0 }
 0x16c   : >> { %v304_v38 = vadd.f32 %v2759_v57, %v260_v2  ;;  %v451_v4 = vadd.f32 %v440_v23, %v411_v52 }
 0x16e   : >> { %v344_v6 = vadd.f32 %v2763_v58, %v304_v38  ;;  %v479_v7 = vadd.f32 %v475_v33, %v451_v4 }
 0x170   : >> { %v372_v8 = vadd.f32 %v368_v59, %v344_v6 }
 0x172   : >> { %v412_v9 = vadd.f32 %v2776_v14, %v372_v8 }
 0x174   : >> { %v452_v5 = vadd.f32 %v442_v29, %v412_v9 }
 0x176   : >> { %v480_v10 = vadd.f32 %v2778_v3, %v452_v5 }
 0x1a3   : >> { %v508_v11 = vpop.permute.xlu2 %507 }
 0x1a4   : >> { %v519_v57 = vadd.f32 %v508_v11, %v479_v7 }
 0x1ab   : >> { %v512_v12 = vpop.permute.xlu2 %511 }
 0x1ac   : >> { %v521_v32 = vadd.f32 %v512_v12, %v2782_v30  ;;  %v607_v30 = vlaneseq (%p228_p4) }
 0x1ae   : > { %v2827_v41 = vshrl.u32 (%p228_p4), %v607_v30, 7  ;;  %v612_v42 = vand.u32 (%p228_p4), 127, %v607_v30 }
 0x1b0   : > { %3476 = vst [vmem:[#allocation3_spill] sm:$0xff] (%p228_p4), %v2827_v41  ;;  %v2830_v43 = vadd.s32 (%p228_p4), 8, %v2827_v41  ;;  %v2833_v44 = vadd.s32 (%p228_p4), 16, %v2827_v41  ;;  %v2835_v45 = vmul.u32 (%p228_p4), 2, %v612_v42 }
 0x1b2   : > { %3477 = vst [vmem:[#allocation4_spill] sm:$0xff] (%p228_p4), %v2830_v43  ;;  %vm614_vm1 = vcmp.eq.s32.totalorder (%p228_p4), %v2827_v41, %v2835_v45  ;;  %vm615_vm2 = vcmp.eq.s32.totalorder (%p228_p4), %v2830_v43, %v2835_v45  ;;  %vm616_vm3 = vcmp.eq.s32.totalorder (%p228_p4), %v2833_v44, %v2835_v45  ;;  %v2844_v46 = vadd.s32 (%p228_p4), 1, %v2835_v45 }
 0x1b3   : > { %3478 = vst [vmem:[#allocation5_spill] sm:$0xff] (%p228_p4), %v2833_v44 }
 0x1b4   : >> { %v550_v13 = vpop.permute.xlu2 %549  ;;  %3479 = vst [vmem:[#allocation6_spill] sm:$0xff] (%p228_p4), %v2835_v45  ;;  %vm624_vm4 = vcmp.eq.s32.totalorder (%p228_p4), %v2827_v41, %v2844_v46  ;;  %vm625_vm5 = vcmp.eq.s32.totalorder (%p228_p4), %v2830_v43, %v2844_v46  ;;  %vm626_vm6 = vcmp.eq.s32.totalorder (%p228_p4), %v2833_v44, %v2844_v46 }
 0x1b5   : > { %3480 = vst [vmem:[#allocation7_spill] sm:$0xff] (%p228_p4), %v2844_v46 }
 0x1bc   : >> { %v570_v17 = vpop.permute.xlu2 %569 }
 0x1c3   : >> { %v514_v15 = vpop.permute.xlu0 %513 }
 0x1c4   : >> { %v510_v63 = vpop.permute.xlu1 %509  ;;  %v522_v14 = vadd.f32 %v514_v15, %v2780_v26  ;;  %v585_v27 = vpop.permute.xlu2 %584 }
 0x1c5   : >> { %v520_v58 = vadd.f32 %v510_v63, %v480_v10 }
 0x1c7   : >> { %v560_v23 = vadd.f32 %v550_v13, %v520_v58 }
 0x1cc   : >> { %v548_v16 = vpop.permute.xlu1 %547 }
 0x1cd   : >> { %v559_v18 = vadd.f32 %v548_v16, %v519_v57  ;;  %v552_v20 = vpop.permute.xlu0 %551 }
 0x1ce   : >> { %v561_v35 = vadd.f32 %v552_v20, %v521_v32 }
 0x1cf   : >> { %v587_v21 = vadd.f32 %v570_v17, %v559_v18 }
 0x1d1   : >> { %v591_v19 = vmax.f32 %v587_v21, 0.0 }
 0x1d3   : >> { %v595_v22 = vpack.c.bf16 %v591_v19, %v591_v19 }
 0x1d4   : >> { %v554_v3 = vpop.permute.xlu1 %553 }
 0x1d5   : >> { %603 = vst.msk [vmem:[%s601_s26] sm:$0xf] %vm602_vm0, %v595_v22  ;;  %v562_v24 = vadd.f32 %v554_v3, %v522_v14  ;;  %v575_v25 = vpop.permute.xlu0 %574 }
 0x1d6   : >> { %v588_v28 = vadd.f32 %v575_v25, %v560_v23 }
 0x1d7   : >> { %v590_v29 = vadd.f32 %v585_v27, %v562_v24 }
 0x1d8   : >> { %v592_v31 = vmax.f32 %v588_v28, 0.0 }
 0x1d9   : >> { %v594_v33 = vmax.f32 %v590_v29, 0.0 }
 0x1da   : >> { %v596_v34 = vpack.c.bf16 %v592_v31, %v592_v31 }
 0x1db   : >> { %v598_v36 = vpack.c.bf16 %v594_v33, %v594_v33 }
 0x1dc   : >> { %604 = vst.msk [vmem:[%s601_s26 + $0x4] sm:$0xf] %vm602_vm0, %v596_v34  ;;  %v580_v26 = vpop.permute.xlu1 %579 }
 0x1dd   : >> { %606 = vst.msk [vmem:[%s601_s26 + $0xc] sm:$0xf] %vm602_vm0, %v598_v36  ;;  %v589_v37 = vadd.f32 %v580_v26, %v561_v35 }
 0x1df   : >> { %v593_v39 = vmax.f32 %v589_v37, 0.0  ;;  %230 = sbr.rel (!%p228_p4) target bundleno = 15 (0xf), region = 101 }
 0x1e1   : >> { %v597_v40 = vpack.c.bf16 %v593_v39, %v593_v39 }
 0x1e3   : >> { %605 = vst.msk [vmem:[%s601_s26 + $0x8] sm:$0xf] %vm602_vm0, %v597_v40 }
 0x1e4 LB: >> { %s2437_s28 = sshll.u32 %s2582_s24, 5  ;;  %s2595_s30 = smov 127   ;;  %v2449_v53 = vld [vmem:[%s3463_s3] sm:$0xff]  ;;  %vm724_vm7 = vcmask 261120   ;;  %v2450_v55 = vld [vmem:[%s3463_s3 + $0x8] sm:$0xff]  ;;  %v2451_v56 = vld [vmem:[%s3463_s3 + $0x10] sm:$0xff]  ;;  %s2582_s24 = sphi %s2852_s24, %s638_s24  }
 0x1e5   : >> { %s2860_s29 = scalar_lea.vmem [#allocation2], %s2437_s28  ;;  %s2596_s6 = smov 126   ;;  %v2452_v60 = vld [vmem:[%s3463_s3 + $0x18] sm:$0xff]  ;;  %v2913_v62 = vld [vmem:[%s3463_s3 + $0x60] sm:$0xff]  ;;  %v2925_v52 = vld [vmem:[%s3463_s3 + $0x68] sm:$0xff]  ;;  %vm1834_vm8 = vcmask 195584  }
 0x1e6   : >> { %v2453_v7 = vld [vmem:[%s3463_s3 + $0x20] sm:$0xff]  ;;  %v2938_v8 = vld [vmem:[%s3463_s3 + $0x70] sm:$0xff]  ;;  %v2454_v11 = vld [vmem:[%s3463_s3 + $0x28] sm:$0xff]  ;;  %s3436_s11 = scalar_lea.vmem %s2645_s27, %s2437_s28  ;;  %vm1960_vm9 = vcmask 93184   ;;  %s638_s24 = sadd.s32 1, %s2582_s24  }
 0x1e7   : >> { %v2457_v5 = vld [vmem:[%s3463_s3 + $0x40] sm:$0xff]  ;;  %v2954_v12 = vld [vmem:[%s3463_s3 + $0x78] sm:$0xff]  ;;  %v2458_v63 = vld [vmem:[%s3463_s3 + $0x48] sm:$0xff]  ;;  %p635_p5 = scmp.ge.s32.totalorder %s638_s24, 12  }
 0x1e8   : >> { %v2455_v57 = vld [vmem:[%s3463_s3 + $0x30] sm:$0xff]  ;;  %v2976_v17 = vld [vmem:[%s3463_s3 + $0xa0] sm:$0xff]  ;;  %v2456_v21 = vld [vmem:[%s3463_s3 + $0x38] sm:$0xff] }
 0x1e9   : >> { %v2459_v20 = vld [vmem:[%s3463_s3 + $0x50] sm:$0xff]  ;;  %v2992_v58 = vld [vmem:[%s3463_s3 + $0xa8] sm:$0xff]  ;;  %v2460_v19 = vld [vmem:[%s3463_s3 + $0x58] sm:$0xff] }
 0x1ea   : >> { %v2442_v47 = vld [vmem:[%s2860_s29 + $0x18] sm:$0xff]  ;;  %v2439_v48 = vld [vmem:[%s2860_s29 + $0x8] sm:$0xff]  ;;  %v2441_v49 = vld [vmem:[%s2860_s29 + $0x10] sm:$0xff] }
 0x1eb   : >> { %841 = vrot.lane.b32.xlu1 %v2442_v47, %s2595_s30  ;;  %720 = vrot.lane.b32.xlu0 %v2439_v48, %s2595_s30  ;;  %v2438_v50 = vld [vmem:[%s2860_s29] sm:$0xff]  ;;  %v2870_v51 = vld [vmem:[%s2860_s29 + $0x28] sm:$0xff] }
 0x1ec   : >> { %936 = vrot.lane.b32.xlu2 %v2439_v48, %s2596_s6  ;;  %882 = vmatpush.bf16.msra.mxu3 %v2442_v47  ;;  %v2879_v54 = vld [vmem:[%s2860_s29 + $0x20] sm:$0xff]  ;;  %v2448_v1 = vld [vmem:[%s2860_s29 + $0x38] sm:$0xff]  ;;  %v2447_v2 = vld [vmem:[%s2860_s29 + $0x30] sm:$0xff] }
 0x1ed   : >> { %806 = vmatpush.bf16.msra.mxu1 %v2439_v48  ;;  %v3010_v23 = vld [vmem:[%s3463_s3 + $0xb0] sm:$0xff]  ;;  %v2465_v3 = vld [vmem:[%s3463_s3 + $0x80] sm:$0xff]  ;;  %v3028_v27 = vld [vmem:[%s3463_s3 + $0xb8] sm:$0xff] }
 0x1ee   : >> { %v2466_v29 = vld [vmem:[%s3463_s3 + $0x88] sm:$0xff]  ;;  %v3046_v36 = vld [vmem:[%s3463_s3 + $0xe0] sm:$0xff]  ;;  %v2467_v26 = vld [vmem:[%s3463_s3 + $0x90] sm:$0xff] }
 0x1ef   : >> { %v3064_v30 = vld [vmem:[%s3463_s3 + $0xe8] sm:$0xff]  ;;  %v2468_v42 = vld [vmem:[%s3463_s3 + $0x98] sm:$0xff] }
 0x1f0   : >> { %883 = vmatpush.bf16.msra.mxu3 %v2441_v49 }
 0x1f1   : >> { %807 = vmatpush.bf16.msra.mxu1 %v2438_v50 }
 0x1f3   : >> { %839 = vrot.lane.b32.xlu1 %v2441_v49, %s2595_s30  ;;  %718 = vrot.lane.b32.xlu0 %v2438_v50, %s2595_s30 }
 0x1f4   : >> { %1128 = vmatpush.bf16.msrb.mxu3 %v2870_v51  ;;  %991 = vrot.lane.b32.xlu2 %v2442_v47, %s2596_s6 }
 0x1f5   : >> { %2164 = vmatmul.msk.bf16.vlgmr.msra.gmra.mxu3 %vm724_vm7, %v2449_v53  ;;  %2148 = vmatmul.msk.bf16.vlgmr.msra.gmra.mxu1 %vm724_vm7, %v2449_v53 }
 0x1f8   : >> { %1129 = vmatpush.bf16.msrb.mxu3 %v2879_v54 }
 0x1fb   : >> { %989 = vrot.lane.b32.xlu1 %v2441_v49, %s2596_s6  ;;  %934 = vrot.lane.b32.xlu0 %v2438_v50, %s2596_s6 }
 0x1fc   : >> { %1239 = vrot.lane.b32.xlu2 %v2870_v51, %s2595_s30 }
 0x203   : >> { %1360 = vrot.lane.b32.xlu1 %v2870_v51, %s2596_s6  ;;  %1237 = vrot.lane.b32.xlu0 %v2879_v54, %s2595_s30 }
 0x204   : >> { %1358 = vrot.lane.b32.xlu2 %v2879_v54, %s2596_s6 }
 0x205   : >> { %2165 = vmatmul.msk.bf16.gmra.mxu3 %vm724_vm7, %v2450_v55  ;;  %2149 = vmatmul.msk.bf16.gmra.mxu1 %vm724_vm7, %v2450_v55  ;;  %v3088_v55 = vld [vmem:[%s3463_s3 + $0xc0] sm:$0xff] }
 0x20b   : >> { %1608 = vrot.lane.b32.xlu0 %v2448_v1, %s2595_s30  ;;  %1606 = vrot.lane.b32.xlu1 %v2447_v2, %s2595_s30 }
 0x20c   : >> { %1729 = vrot.lane.b32.xlu2 %v2448_v1, %s2596_s6 }
 0x213   : >> { %1727 = vrot.lane.b32.xlu0 %v2447_v2, %s2596_s6 }
 0x215   : >> { %2166 = vmatmul.msk.bf16.gmra.mxu3 %vm724_vm7, %v2451_v56  ;;  %2150 = vmatmul.msk.bf16.gmra.mxu1 %vm724_vm7, %v2451_v56 }
 0x225   : >> { %2167 = vmatmul.msk.bf16.gmra.mxu3 %vm724_vm7, %v2452_v60  ;;  %2151 = vmatmul.msk.bf16.gmra.mxu1 %vm724_vm7, %v2452_v60 }
 0x235   : >> { %2236 = vmatmul.msk.bf16.vlgmr.msrb.gmra.mxu3 %vm724_vm7, %v2913_v62 }
 0x245   : >> { %2237 = vmatmul.msk.bf16.gmra.mxu3 %vm724_vm7, %v2925_v52 }
 0x246   : >> { %v937_v61 = vpop.permute.xlu2 %936 }
 0x24e   : >> { %v992_v0 = vpop.permute.xlu2 %991 }
 0x24f   : >> { %1001 = vmatpush.bf16.msrb.mxu1 %v992_v0 }
 0x255   : >> { %2238 = vmatmul.msk.bf16.gmra.mxu3 %vm724_vm7, %v2938_v8 }
 0x256   : >> { %v1240_v13 = vpop.permute.xlu2 %1239 }
 0x25d   : >> { %v842_v38 = vpop.permute.xlu1 %841  ;;  %v721_v4 = vpop.permute.xlu0 %720 }
 0x25e   : >> { %743 = vmatpush.bf16.msra.mxu0 %v721_v4  ;;  %851 = vmatpush.bf16.msra.mxu2 %v842_v38  ;;  %v2970_v16 = vpop.permute.xlu2 %1358  ;;  %v3109_v4 = vld [vmem:[%s3463_s3 + $0xf8] sm:$0xff] }
 0x265   : >> { %v840_v59 = vpop.permute.xlu1 %839  ;;  %v719_v6 = vpop.permute.xlu0 %718  ;;  %2239 = vmatmul.msk.bf16.gmra.mxu3 %vm724_vm7, %v2954_v12 }
 0x266   : >> { %744 = vmatpush.bf16.msra.mxu0 %v719_v6  ;;  %852 = vmatpush.bf16.msra.mxu2 %v840_v59 }
 0x269   : >> { %2128 = vmatmul.msk.bf16.vlgmr.msra.gmra.mxu0 %vm724_vm7, %v2453_v7  ;;  %2160 = vmatmul.msk.bf16.vlgmr.msra.gmra.mxu2 %vm724_vm7, %v2453_v7 }
 0x26a   : >> { %958 = vmatpush.bf16.msrb.mxu0 %v937_v61  ;;  %1079 = vmatpush.bf16.msrb.mxu2 %v2442_v47 }
 0x26d   : >> { %v990_v9 = vpop.permute.xlu1 %989  ;;  %v935_v10 = vpop.permute.xlu0 %934 }
 0x26e   : >> { %1080 = vmatpush.bf16.msrb.mxu2 %v2441_v49  ;;  %1002 = vmatpush.bf16.msrb.mxu1 %v990_v9 }
 0x26f   : >> { %959 = vmatpush.bf16.msrb.mxu0 %v935_v10 }
 0x271   : >> { %2196 = vmatmul.msk.bf16.vlgmr.msrb.gmra.mxu1 %vm724_vm7, %v2457_v5 }
 0x272   : >> { %1327 = vmatpush.bf16.msra.mxu2 %v992_v0  ;;  %1249 = vmatpush.bf16.msra.mxu1 %v1240_v13  ;;  %v2999_v14 = vpop.f32.mrf.mxu1 }
 0x273   : >> { %1206 = vmatpush.bf16.msra.mxu0 %v842_v38 }
 0x275   : >> { %v2962_v15 = vpop.permute.xlu1 %1360  ;;  %v1238_v18 = vpop.permute.xlu0 %1237 }
 0x276   : >> { %1328 = vmatpush.bf16.msra.mxu2 %v990_v9  ;;  %1370 = vmatpush.bf16.msra.mxu3 %v2962_v15 }
 0x277   : >> { %1207 = vmatpush.bf16.msra.mxu0 %v840_v59  ;;  %1250 = vmatpush.bf16.msra.mxu1 %v1238_v18 }
 0x278   : >> { %v885_v25 = vpop.f32.mrf.mxu3 }
 0x279   : >> { %2129 = vmatmul.msk.bf16.gmra.mxu0 %vm724_vm7, %v2454_v11  ;;  %2161 = vmatmul.msk.bf16.gmra.mxu2 %vm724_vm7, %v2454_v11 }
 0x27a   : >> { %1371 = vmatpush.bf16.msra.mxu3 %v2970_v16  ;;  %v3002_v22 = vpop.f32.mrf.mxu1 }
 0x27b   : >> { %1497 = vmatpush.bf16.msrb.mxu1 %v2448_v1 }
 0x27d   : >> { %2300 = vmatmul.msk.bf16.vlgmr.msra.gmra.mxu3 %vm724_vm7, %v2976_v17  ;;  %v1609_v32 = vpop.permute.xlu0 %1608  ;;  %v1607_v34 = vpop.permute.xlu1 %1606 }
 0x27e   : >> { %1618 = vmatpush.bf16.msrb.mxu3 %v1609_v32 }
 0x27f   : >> { %1498 = vmatpush.bf16.msrb.mxu1 %v2447_v2 }
 0x280   : >> { %v887_v31 = vpop.f32.mrf.mxu3 }
 0x281   : >> { %2197 = vmatmul.msk.bf16.gmra.mxu1 %vm724_vm7, %v2458_v63 }
 0x282   : >> { %v3020_v24 = vpop.f32.mrf.mxu1  ;;  %1619 = vmatpush.bf16.msrb.mxu3 %v1607_v34 }
 0x288   : >> { %v890_v35 = vpop.f32.mrf.mxu3 }
 0x289   : >> { %2130 = vmatmul.msk.bf16.gmra.mxu0 %vm724_vm7, %v2455_v57  ;;  %2162 = vmatmul.msk.bf16.gmra.mxu2 %vm724_vm7, %v2455_v57  ;;  %v1730_v57 = vpop.permute.xlu2 %1729 }
 0x28a   : >> { %v3030_v28 = vpop.f32.mrf.mxu1 }
 0x28d   : >> { %2301 = vmatmul.msk.bf16.gmra.mxu3 %vm724_vm7, %v2992_v58 }
 0x290   : >> { %v892_v39 = vpop.f32.mrf.mxu3 }
 0x291   : >> { %2198 = vmatmul.msk.bf16.gmra.mxu1 %vm724_vm7, %v2459_v20 }
 0x292   : >> { %v3038_v33 = vpop.f32.mrf.mxu1 }
 0x298   : >> { %v895_v47 = vpop.f32.mrf.mxu3 }
 0x299   : >> { %2131 = vmatmul.msk.bf16.gmra.mxu0 %vm724_vm7, %v2456_v21  ;;  %2163 = vmatmul.msk.bf16.gmra.mxu2 %vm724_vm7, %v2456_v21 }
 0x29a   : >> { %v3053_v37 = vpop.f32.mrf.mxu1 }
 0x29d   : >> { %2302 = vmatmul.msk.bf16.gmra.mxu3 %vm724_vm7, %v3010_v23 }
 0x2a0   : >> { %v897_v50 = vpop.f32.mrf.mxu3 }
 0x2a1   : >> { %2199 = vmatmul.msk.bf16.gmra.mxu1 %vm724_vm7, %v2460_v19 }
 0x2a2   : >> { %v3059_v40 = vpop.f32.mrf.mxu1 }
 0x2a9   : >> { %2224 = vmatmul.msk.bf16.vlgmr.msrb.gmra.mxu2 %vm724_vm7, %v2913_v62  ;;  %2192 = vmatmul.msk.bf16.vlgmr.msrb.gmra.mxu0 %vm724_vm7, %v2457_v5  ;;  %v900_v62 = vpop.f32.mrf.mxu3 }
 0x2aa   : >> { %1575 = vmatpush.bf16.msrb.mxu2 %v1240_v13  ;;  %1448 = vmatpush.bf16.msrb.mxu0 %v2870_v51  ;;  %v3072_v48 = vpop.f32.mrf.mxu1  ;;  %v3083_v51 = vld [vmem:[%s3463_s3 + $0xf0] sm:$0xff] }
 0x2ad   : >> { %2303 = vmatmul.msk.bf16.gmra.mxu3 %vm724_vm7, %v3028_v27 }
 0x2ae   : >> { %1576 = vmatpush.bf16.msrb.mxu2 %v1238_v18  ;;  %1449 = vmatpush.bf16.msrb.mxu0 %v2879_v54  ;;  %v3134_v18 = vld [vmem:[%s3463_s3 + $0xd0] sm:$0xff] }
 0x2b1   : >> { %2268 = vmatmul.msk.bf16.vlgmr.msra.gmra.mxu1 %vm724_vm7, %v2465_v3  ;;  %v902_v6 = vpop.f32.mrf.mxu3 }
 0x2b2   : >> { %1739 = vmatpush.bf16.msra.mxu1 %v1730_v57 }
 0x2b9   : >> { %2193 = vmatmul.msk.bf16.gmra.mxu0 %vm724_vm7, %v2458_v63  ;;  %2225 = vmatmul.msk.bf16.gmra.mxu2 %vm724_vm7, %v2925_v52  ;;  %v1131_v34 = vpop.f32.mrf.mxu3 }
 0x2bd   : >> { %2372 = vmatmul.msk.bf16.vlgmr.msrb.gmra.mxu3 %vm724_vm7, %v3046_v36 }
 0x2c1   : >> { %2269 = vmatmul.msk.bf16.gmra.mxu1 %vm724_vm7, %v2466_v29 }
 0x2c9   : >> { %2194 = vmatmul.msk.bf16.gmra.mxu0 %vm724_vm7, %v2459_v20  ;;  %2226 = vmatmul.msk.bf16.gmra.mxu2 %vm724_vm7, %v2938_v8  ;;  %v3114_v8 = vld [vmem:[%s3463_s3 + $0xc8] sm:$0xff]  ;;  %v1728_v20 = vpop.permute.xlu0 %1727 }
 0x2ca   : >> { %1740 = vmatpush.bf16.msra.mxu1 %v1728_v20 }
 0x2cd   : >> { %2373 = vmatmul.msk.bf16.gmra.mxu3 %vm724_vm7, %v3064_v30 }
 0x2d1   : >> { %2270 = vmatmul.msk.bf16.gmra.mxu1 %vm724_vm7, %v2467_v26 }
 0x2d9   : >> { %2195 = vmatmul.msk.bf16.gmra.mxu0 %vm724_vm7, %v2460_v19  ;;  %2227 = vmatmul.msk.bf16.gmra.mxu2 %vm724_vm7, %v2954_v12 }
 0x2dd   : >> { %2374 = vmatmul.msk.bf16.gmra.mxu3 %vm724_vm7, %v3083_v51 }
 0x2e1   : >> { %2271 = vmatmul.msk.bf16.gmra.mxu1 %vm724_vm7, %v2468_v42 }
 0x2e6   : >> { %v3074_v49 = vpop.f32.mrf.mxu0 }
 0x2e9   : >> { %2264 = vmatmul.msk.bf16.vlgmr.msra.gmra.mxu0 %vm724_vm7, %v2465_v3  ;;  %2296 = vmatmul.msk.bf16.vlgmr.msra.gmra.mxu2 %vm724_vm7, %v2976_v17 }
 0x2ea   : >> { %1696 = vmatpush.bf16.msra.mxu0 %v2962_v15 }
 0x2ec   : >> { %v854_v53 = vpop.f32.mrf.mxu2 }
 0x2ed   : >> { %v886_v54 = vadd.f32 %v885_v25, %v854_v53  ;;  %2375 = vmatmul.msk.bf16.gmra.mxu3 %vm724_vm7, %v3109_v4 }
 0x2ee   : >> { %v3092_v56 = vpop.f32.mrf.mxu0  ;;  %v1004_v60 = vpop.f32.mrf.mxu1  ;;  %1697 = vmatpush.bf16.msra.mxu0 %v2970_v16 }
 0x2ef   : >> { %v3095_v61 = vadd.f32 %v1004_v60, %v886_v54 }
 0x2f1   : >> { %2340 = vmatmul.msk.bf16.vlgmr.msrb.gmra.mxu1 %vm724_vm7, %v3088_v55 }
 0x2f4   : >> { %v856_v0 = vpop.f32.mrf.mxu2 }
 0x2f5   : >> { %v888_v1 = vadd.f32 %v887_v31, %v856_v0  ;;  %v1133_v0 = vpop.f32.mrf.mxu3 }
 0x2f6   : >> { %v3099_v2 = vpop.f32.mrf.mxu0  ;;  %v1006_v52 = vpop.f32.mrf.mxu1 }
 0x2f7   : >> { %v3101_v38 = vadd.f32 %v1006_v52, %v888_v1 }
 0x2f9   : >> { %2265 = vmatmul.msk.bf16.gmra.mxu0 %vm724_vm7, %v2466_v29  ;;  %2297 = vmatmul.msk.bf16.gmra.mxu2 %vm724_vm7, %v2992_v58 }
 0x2fc   : >> { %v859_v59 = vpop.f32.mrf.mxu2 }
 0x2fd   : >> { %v891_v7 = vadd.f32 %v890_v35, %v859_v59  ;;  %v1151_v59 = vadd.f32 %v1131_v34, %v3095_v61  ;;  %v2597_v34 = vmov 0  }
 0x2fe   : >> { %v3118_v9 = vpop.f32.mrf.mxu0  ;;  %v1009_v5 = vpop.f32.mrf.mxu1  ;;  %2557 = vset.pattern.permute.xlu1 %v2597_v34  ;;  %2559 = vset.pattern.permute.xlu0 %v2597_v34 }
 0x2ff   : >> { %v3120_v10 = vadd.f32 %v1009_v5, %v891_v7  ;;  %2558 = vset.pattern.permute.xlu2 %v2597_v34 }
 0x301   : >> { %2341 = vmatmul.msk.bf16.gmra.mxu1 %vm724_vm7, %v3114_v8 }
 0x304   : >> { %v861_v11 = vpop.f32.mrf.mxu2 }
 0x305   : >> { %v893_v12 = vadd.f32 %v892_v39, %v861_v11 }
 0x306   : >> { %v3124_v13 = vpop.f32.mrf.mxu0  ;;  %v1011_v63 = vpop.f32.mrf.mxu1 }
 0x307   : >> { %v3126_v15 = vadd.f32 %v1011_v63, %v893_v12 }
 0x309   : >> { %2266 = vmatmul.msk.bf16.gmra.mxu0 %vm724_vm7, %v2467_v26  ;;  %2298 = vmatmul.msk.bf16.gmra.mxu2 %vm724_vm7, %v3010_v23  ;;  %v3152_v26 = vld [vmem:[%s3463_s3 + $0xd8] sm:$0xff] }
 0x30c   : >> { %v864_v16 = vpop.f32.mrf.mxu2 }
 0x30d   : >> { %v896_v17 = vadd.f32 %v895_v47, %v864_v16  ;;  %v817_v16 = vadd.f32 %v3030_v28, %v3118_v9  ;;  %v820_v28 = vadd.f32 %v3038_v33, %v3124_v13 }
 0x30e   : >> { %v3136_v21 = vpop.f32.mrf.mxu0  ;;  %v1014_v58 = vpop.f32.mrf.mxu1 }
 0x30f   : >> { %v3138_v19 = vadd.f32 %v1014_v58, %v896_v17  ;;  %v822_v33 = vadd.f32 %v3053_v37, %v3136_v21 }
 0x311   : >> { %2342 = vmatmul.msk.bf16.gmra.mxu1 %vm724_vm7, %v3134_v18 }
 0x314   : >> { %v866_v23 = vpop.f32.mrf.mxu2 }
 0x315   : >> { %v898_v3 = vadd.f32 %v897_v50, %v866_v23 }
 0x316   : >> { %v3142_v25 = vpop.f32.mrf.mxu0  ;;  %v1016_v29 = vpop.f32.mrf.mxu1 }
 0x317   : >> { %v3144_v31 = vadd.f32 %v1016_v29, %v898_v3  ;;  %v825_v21 = vadd.f32 %v3059_v40, %v3142_v25 }
 0x319   : >> { %2267 = vmatmul.msk.bf16.gmra.mxu0 %vm724_vm7, %v2468_v42  ;;  %2299 = vmatmul.msk.bf16.gmra.mxu2 %vm724_vm7, %v3028_v27  ;;  %v810_v27 = vadd.f32 %v2999_v14, %v3074_v49  ;;  %v3177_v14 = vld [vmem:[%s3463_s3 + $0x100] sm:$0xff] }
 0x31c   : >> { %v869_v32 = vpop.f32.mrf.mxu2 }
 0x31d   : >> { %v901_v35 = vadd.f32 %v900_v62, %v869_v32 }
 0x31e   : >> { %v763_v39 = vpop.f32.mrf.mxu0  ;;  %v1019_v47 = vpop.f32.mrf.mxu1 }
 0x31f   : >> { %v3155_v50 = vadd.f32 %v3072_v48, %v763_v39  ;;  %v3157_v53 = vadd.f32 %v1019_v47, %v901_v35  ;;  %v812_v48 = vadd.f32 %v3002_v22, %v3092_v56  ;;  %v815_v22 = vadd.f32 %v3020_v24, %v3099_v2  ;;  %v1778_v35 = vld [vmem:[%s3464_s4] sm:$0xff] }
 0x320   : >> { %v1152_v56 = vadd.f32 %v1133_v0, %v3101_v38  ;;  %v3206_v38 = vld [vmem:[%s3463_s3 + $0x108] sm:$0xff]  ;;  %1788 = vperm.xlu1 %2557, %v1778_v35  }
 0x321   : >> { %2343 = vmatmul.msk.bf16.gmra.mxu1 %vm724_vm7, %v3152_v26 }
 0x324   : >> { %v871_v42 = vpop.f32.mrf.mxu2 }
 0x325   : >> { %v903_v54 = vadd.f32 %v902_v6, %v871_v42 }
 0x326   : >> { %v961_v60 = vpop.f32.mrf.mxu0  ;;  %v1021_v62 = vpop.f32.mrf.mxu1 }
 0x327   : >> { %v3163_v1 = vadd.f32 %v961_v60, %v810_v27  ;;  %v3165_v52 = vadd.f32 %v1021_v62, %v903_v54 }
 0x329   : >> { %2328 = vmatmul.msk.bf16.vlgmr.msrb.gmra.mxu0 %vm724_vm7, %v3088_v55  ;;  %2368 = vmatmul.msk.bf16.vlgmr.msrb.gmra.mxu2 %vm724_vm7, %v3046_v36  ;;  %v1136_v55 = vpop.f32.mrf.mxu3 }
 0x32a   : >> { %v1153_v24 = vadd.f32 %v1136_v55, %v3120_v10 }
 0x32c   : >> { %v3185_v36 = vpop.f32.mrf.mxu2 }
 0x32e   : >> { %v963_v49 = vpop.f32.mrf.mxu0  ;;  %v1252_v6 = vpop.f32.mrf.mxu1 }
 0x32f   : >> { %v3179_v7 = vadd.f32 %v963_v49, %v812_v48  ;;  %v3181_v5 = vadd.f32 %v1252_v6, %v1151_v59  ;;  %v1783_v48 = vld [vmem:[%s3464_s4 + $0x28] sm:$0xff]  ;;  %v2484_v59 = vld [vmem:[%s3463_s3 + $0x118] sm:$0xff] }
 0x331   : >> { %2404 = vmatmul.msk.bf16.vlgmr.msra.gmra.mxu1 %vm724_vm7, %v3177_v14  ;;  %v1138_v57 = vpop.f32.mrf.mxu3 }
 0x334   : >> { %v3201_v2 = vpop.f32.mrf.mxu2 }
 0x336   : >> { %v966_v61 = vpop.f32.mrf.mxu0  ;;  %v1254_v11 = vpop.f32.mrf.mxu1 }
 0x337   : >> { %v3190_v12 = vadd.f32 %v966_v61, %v815_v22  ;;  %v3192_v63 = vadd.f32 %v1254_v11, %v1152_v56  ;;  %v1102_v56 = vadd.f32 %v3185_v36, %v3163_v1  ;;  %v1103_v1 = vadd.f32 %v3201_v2, %v3179_v7 }
 0x339   : >> { %2329 = vmatmul.msk.bf16.gmra.mxu0 %vm724_vm7, %v3114_v8  ;;  %2369 = vmatmul.msk.bf16.gmra.mxu2 %vm724_vm7, %v3064_v30  ;;  %v1154_v30 = vadd.f32 %v1138_v57, %v3126_v15  ;;  %v1141_v9 = vpop.f32.mrf.mxu3  ;;  %v3236_v15 = vld [vmem:[%s3463_s3 + $0x110] sm:$0xff] }
 0x33a   : >> { %v1155_v13 = vadd.f32 %v1141_v9, %v3138_v19 }
 0x33c   : >> { %v3217_v3 = vpop.f32.mrf.mxu2 }
 0x33e   : >> { %v968_v17 = vpop.f32.mrf.mxu0  ;;  %v1257_v20 = vpop.f32.mrf.mxu1 }
 0x33f   : >> { %v3208_v58 = vadd.f32 %v968_v17, %v817_v16  ;;  %v3210_v8 = vadd.f32 %v1257_v20, %v1153_v24  ;;  %v1779_v24 = vld [vmem:[%s3464_s4 + $0x8] sm:$0xff]  ;;  %v1785_v17 = vld [vmem:[%s3464_s4 + $0x38] sm:$0xff]  ;;  %v1782_v20 = vld [vmem:[%s3464_s4 + $0x20] sm:$0xff] }
 0x340   : >> { %1793 = vperm.xlu2 %2558, %v1779_v24  }
 0x341   : >> { %2405 = vmatmul.msk.bf16.gmra.mxu1 %vm724_vm7, %v3206_v38 }
 0x344   : >> { %v1089_v37 = vpop.f32.mrf.mxu2 }
 0x345   : >> { %v1105_v2 = vadd.f32 %v1089_v37, %v3208_v58  ;;  %v2598_v58 = vmov 1.0  }
 0x346   : >> { %v971_v10 = vpop.f32.mrf.mxu0  ;;  %v1259_v23 = vpop.f32.mrf.mxu1  ;;  %2408 = vmatpush.msk.msra.mxu2 %vm616_vm3, %v2598_v58  ;;  %2419 = vmatpush.msk.msra.mxu3 %vm626_vm6, %v2598_v58 }
 0x347   : >> { %v3219_v29 = vadd.f32 %v971_v10, %v820_v28  ;;  %v3221_v32 = vadd.f32 %v1259_v23, %v1154_v30  ;;  %v1104_v30 = vadd.f32 %v3217_v3, %v3190_v12 }
 0x348   : >> { %1808 = vperm.xlu2 %2558, %v1782_v20   ;;  %2409 = vmatpush.msk.msra.mxu2 %vm615_vm2, %v2598_v58 }
 0x349   : >> { %2330 = vmatmul.msk.bf16.gmra.mxu0 %vm724_vm7, %v3134_v18  ;;  %2370 = vmatmul.msk.bf16.gmra.mxu2 %vm724_vm7, %v3083_v51  ;;  %v1781_v51 = vld [vmem:[%s3464_s4 + $0x18] sm:$0xff]  ;;  %v1143_v18 = vpop.f32.mrf.mxu3 }
 0x34a   : >> { %1803 = vperm.xlu1 %2557, %v1781_v51   ;;  %v1156_v19 = vadd.f32 %v1143_v18, %v3144_v31  ;;  %2420 = vmatpush.msk.msra.mxu3 %vm625_vm5, %v2598_v58 }
 0x34b   : >> { %2410 = vmatpush.msk.msra.mxu2 %vm614_vm1, %v2598_v58 }
 0x34c   : >> { %v1092_v25 = vpop.f32.mrf.mxu2  ;;  %2421 = vmatpush.msk.msra.mxu3 %vm624_vm4, %v2598_v58 }
 0x34d   : >> { %v1106_v12 = vadd.f32 %v1092_v25, %v3219_v29 }
 0x34e   : >> { %v973_v39 = vpop.f32.mrf.mxu0  ;;  %v1262_v47 = vpop.f32.mrf.mxu1 }
 0x34f   : >> { %v3238_v42 = vadd.f32 %v973_v39, %v822_v33  ;;  %v3240_v27 = vadd.f32 %v1262_v47, %v1155_v13 }
 0x351   : >> { %2406 = vmatmul.msk.bf16.gmra.mxu1 %vm724_vm7, %v3236_v15  ;;  %v1146_v40 = vpop.f32.mrf.mxu3 }
 0x352   : >> { %1813 = vperm.xlu1 %2557, %v1783_v48   ;;  %v1157_v31 = vadd.f32 %v1146_v40, %v3157_v53 }
 0x354   : >> { %v1094_v61 = vpop.f32.mrf.mxu2 }
 0x356   : >> { %v976_v54 = vpop.f32.mrf.mxu0  ;;  %v1264_v60 = vpop.f32.mrf.mxu1 }
 0x357   : >> { %v3250_v62 = vadd.f32 %v976_v54, %v825_v21  ;;  %v3252_v0 = vadd.f32 %v1264_v60, %v1156_v19 }
 0x359   : >> { %2331 = vmatmul.msk.bf16.gmra.mxu0 %vm724_vm7, %v3152_v26  ;;  %2371 = vmatmul.msk.bf16.gmra.mxu2 %vm724_vm7, %v3109_v4  ;;  %v1780_v26 = vld [vmem:[%s3464_s4 + $0x10] sm:$0xff]  ;;  %v1148_v4 = vpop.f32.mrf.mxu3 }
 0x35a   : >> { %1798 = vperm.xlu0 %2559, %v1780_v26   ;;  %v1158_v53 = vadd.f32 %v1148_v4, %v3165_v52 }
 0x35c   : >> { %v1097_v28 = vpop.f32.mrf.mxu2 }
 0x35e   : >> { %v978_v49 = vpop.f32.mrf.mxu0  ;;  %v1267_v6 = vpop.f32.mrf.mxu1 }
 0x35f   : >> { %v988_v55 = vadd.f32 %v978_v49, %v3155_v50  ;;  %v3266_v22 = vadd.f32 %v1267_v6, %v1157_v31 }
 0x361   : >> { %2407 = vmatmul.msk.bf16.gmra.mxu1 %vm724_vm7, %v2484_v59  ;;  %v1373_v35 = vpop.f32.mrf.mxu3 }
 0x362   : >> { %1823 = vperm.xlu0 %2559, %v1785_v17  }
 0x364   : >> { %v1099_v7 = vpop.f32.mrf.mxu2 }
 0x365   : >> { %v1109_v48 = vadd.f32 %v1099_v7, %v988_v55 }
 0x366   : >> { %v1209_v11 = vpop.f32.mrf.mxu0  ;;  %v1269_v57 = vpop.f32.mrf.mxu1 }
 0x367   : >> { %v3275_v16 = vadd.f32 %v1209_v11, %v1102_v56  ;;  %v3277_v50 = vadd.f32 %v1269_v57, %v1158_v53 }
 0x369   : >> { %3486 = vst [vmem:[#allocation8_spill] sm:$0xff] %v3277_v50  ;;  %2400 = vmatmul.msk.bf16.vlgmr.msra.gmra.mxu0 %vm724_vm7, %v3177_v14  ;;  %v1784_v14 = vld [vmem:[%s3464_s4 + $0x30] sm:$0xff]  ;;  %v1375_v47 = vpop.f32.mrf.mxu3 }
 0x36a   : >> { %1818 = vperm.xlu2 %2558, %v1784_v14   ;;  %v1394_v44 = vadd.f32 %v1375_v47, %v3192_v63 }
 0x36c   : >> { %v1330_v33 = vpop.f32.mrf.mxu2 }
 0x36e   : >> { %v1211_v52 = vpop.f32.mrf.mxu0  ;;  %v1500_v3 = vpop.f32.mrf.mxu1 }
 0x36f   : >> { %v3289_v36 = vadd.f32 %v1211_v52, %v1103_v1 }
 0x371   : >> { %v1378_v21 = vpop.f32.mrf.mxu3 }
 0x372   : >> { %v1395_v47 = vadd.f32 %v1378_v21, %v3210_v8 }
 0x374   : >> { %v1332_v51 = vpop.f32.mrf.mxu2 }
 0x376   : >> { %v1214_v9 = vpop.f32.mrf.mxu0  ;;  %v1502_v37 = vpop.f32.mrf.mxu1 }
 0x377   : >> { %v3296_v10 = vadd.f32 %v1214_v9, %v1104_v30 }
 0x379   : >> { %2401 = vmatmul.msk.bf16.gmra.mxu0 %vm724_vm7, %v3206_v38  ;;  %v1107_v38 = vadd.f32 %v1094_v61, %v3238_v42  ;;  %v3340_v31 = vpop.f32.mrf.mxu3 }
 0x37a   : >> { %v1396_v21 = vadd.f32 %v3340_v31, %v3221_v32 }
 0x37c   : >> { %v3335_v54 = vpop.f32.mrf.mxu2 }
 0x37e   : >> { %v1216_v23 = vpop.f32.mrf.mxu0  ;;  %v1505_v60 = vpop.f32.mrf.mxu1 }
 0x37f   : >> { %v3304_v34 = vadd.f32 %v1216_v23, %v1105_v2 }
 0x381   : >> { %v3346_v26 = vpop.f32.mrf.mxu3 }
 0x384   : >> { %v3342_v49 = vpop.f32.mrf.mxu2 }
 0x386   : >> { %v1219_v13 = vpop.f32.mrf.mxu0  ;;  %v3344_v6 = vpop.f32.mrf.mxu1 }
 0x387   : >> { %v3307_v39 = vadd.f32 %v1219_v13, %v1106_v12 }
 0x389   : >> { %2402 = vmatmul.msk.bf16.gmra.mxu0 %vm724_vm7, %v3236_v15  ;;  %v1108_v15 = vadd.f32 %v1097_v28, %v3250_v62 }
 0x38c   : >> { %v3348_v4 = vpop.f32.mrf.mxu2 }
 0x38e   : >> { %v1221_v18 = vpop.f32.mrf.mxu0  ;;  %v3350_v53 = vpop.f32.mrf.mxu1 }
 0x38f   : >> { %v3318_v29 = vadd.f32 %v1221_v18, %v1107_v38  ;;  %v1393_v18 = vadd.f32 %v1373_v35, %v3181_v5 }
 0x392   : >> { %v1789_v5 = vpop.permute.xlu1 %1788 }
 0x394   : >> { %v3354_v55 = vpop.f32.mrf.mxu2 }
 0x396   : >> { %v1224_v42 = vpop.f32.mrf.mxu0  ;;  %v3356_v11 = vpop.f32.mrf.mxu1 }
 0x397   : >> { %v3333_v19 = vadd.f32 %v1224_v42, %v1108_v15  ;;  %v1350_v15 = vadd.f32 %v1330_v33, %v3275_v16  ;;  %v1520_v42 = vadd.f32 %v1500_v3, %v1393_v18 }
 0x399   : >> { %2403 = vmatmul.msk.bf16.gmra.mxu0 %vm724_vm7, %v2484_v59  ;;  %v3352_v59 = vpop.f32.mrf.mxu3 }
 0x39c   : >> { %v3362_v17 = vpop.f32.mrf.mxu2 }
 0x39e   : >> { %v1226_v40 = vpop.f32.mrf.mxu0  ;;  %v3364_v1 = vpop.f32.mrf.mxu1 }
 0x39f   : >> { %v3338_v25 = vadd.f32 %v1226_v40, %v1109_v48 }
 0x3a1   : >> { %3487 = vst [vmem:[#allocation9_spill] sm:$0xff] %v3338_v25  ;;  %v3360_v24 = vpop.f32.mrf.mxu3  ;;  %v1351_v25 = vadd.f32 %v1332_v51, %v3289_v36 }
 0x3a4   : >> { %v3370_v28 = vpop.f32.mrf.mxu2 }
 0x3a5   : >> { %3489 = vst [vmem:[#allocation11_spill] sm:$0xff] %v3370_v28 }
 0x3a6   : >> { %v1451_v62 = vpop.f32.mrf.mxu0  ;;  %v3372_v30 = vpop.f32.mrf.mxu1 }
 0x3a7   : >> { %3490 = vst [vmem:[#allocation12_spill] sm:$0xff] %v3372_v30  ;;  %v1471_v48 = vadd.f32 %v1451_v62, %v1350_v15 }
 0x3a9   : >> { %v3368_v20 = vpop.f32.mrf.mxu3 }
 0x3aa   : >> { %3488 = vst [vmem:[#allocation10_spill] sm:$0xff] %v3368_v20  ;;  %v1521_v20 = vadd.f32 %v1502_v37, %v1394_v44  ;;  %v1352_v44 = vadd.f32 %v3335_v54, %v3296_v10  ;;  %v1353_v54 = vadd.f32 %v3342_v49, %v3304_v34  ;;  %v1397_v34 = vadd.f32 %v3346_v26, %v3240_v27 }
 0x3ac   : >> { %v1578_v7 = vpop.f32.mrf.mxu2 }
 0x3ad   : >> { %v1598_v41 = vadd.f32 %v1578_v7, %v1471_v48 }
 0x3ae   : >> { %v1453_v56 = vpop.f32.mrf.mxu0  ;;  %v1742_v2 = vpop.f32.mrf.mxu1 }
 0x3af   : >> { %v1472_v35 = vadd.f32 %v1453_v56, %v1351_v25  ;;  %v1794_v25 = vpop.permute.xlu2 %1793 }
 0x3b1   : >> { %v1621_v14 = vpop.f32.mrf.mxu3 }
 0x3b2   : >> { %v1641_v40 = vadd.f32 %v1621_v14, %v1520_v42 }
 0x3b4   : >> { %v1580_v13 = vpop.f32.mrf.mxu2  ;;  %v1762_v46 = vadd.f32 %v1742_v2, %v1641_v40 }
 0x3b5   : >> { %v1599_v3 = vadd.f32 %v1580_v13, %v1472_v35 }
 0x3b6   : >> { %v1456_v61 = vpop.f32.mrf.mxu0  ;;  %v1744_v58 = vpop.f32.mrf.mxu1 }
 0x3b7   : >> { %v1473_v62 = vadd.f32 %v1456_v61, %v1352_v44 }
 0x3b9   : >> { %v1623_v12 = vpop.f32.mrf.mxu3 }
 0x3ba   : >> { %v1642_v33 = vadd.f32 %v1623_v12, %v1521_v20 }
 0x3bc   : >> { %v1583_v28 = vpop.f32.mrf.mxu2  ;;  %v1804_v15 = vpop.permute.xlu1 %1803 }
 0x3bd   : >> { %v1600_v14 = vadd.f32 %v1583_v28, %v1473_v62 }
 0x3be   : >> { %v3358_v57 = vpop.f32.mrf.mxu0  ;;  %v1747_v50 = vpop.f32.mrf.mxu1 }
 0x3c1   : >> { %v1626_v45 = vpop.f32.mrf.mxu3 }
 0x3c4   : >> { %v1585_v37 = vpop.f32.mrf.mxu2 }
 0x3c6   : >> { %v3366_v52 = vpop.f32.mrf.mxu0  ;;  %v1749_v20 = vpop.f32.mrf.mxu1 }
 0x3c9   : >> { %v1628_v36 = vpop.f32.mrf.mxu3 }
 0x3cc   : >> { %v1799_v2 = vpop.permute.xlu0 %1798  ;;  %v1588_v13 = vpop.f32.mrf.mxu2 }
 0x3ce   : >> { %v3374_v9 = vpop.f32.mrf.mxu0  ;;  %v1752_v32 = vpop.f32.mrf.mxu1 }
 0x3d1   : >> { %v1631_v12 = vpop.f32.mrf.mxu3 }
 0x3d4   : >> { %v1590_v27 = vpop.f32.mrf.mxu2 }
 0x3d6   : >> { %v3376_v23 = vpop.f32.mrf.mxu0 }
 0x3de   : >> { %v3378_v38 = vpop.f32.mrf.mxu0 }
 0x3df   : >> { %3491 = vst [vmem:[#allocation13_spill] sm:$0xff] %v3378_v38 }
 0x3e6   : >> { %v1699_v43 = vpop.f32.mrf.mxu0 }
 0x3e7   : >> { %v1719_v30 = vadd.f32 %v1699_v43, %v1598_v41  ;;  %v1763_v41 = vadd.f32 %v1744_v58, %v1642_v33  ;;  %v1355_v33 = vadd.f32 %v3354_v55, %v3318_v29  ;;  %v1593_v55 = vpop.f32.mrf.mxu2 }
 0x3e9   : >> { %v1770_v38 = vmax.f32 %v1719_v30, %v1762_v46  ;;  %v1522_v46 = vadd.f32 %v1505_v60, %v1395_v47  ;;  %v1523_v60 = vadd.f32 %v3344_v6, %v1396_v21  ;;  %v1354_v6 = vadd.f32 %v3348_v4, %v3307_v39 }
 0x3ea   : >> { %v1476_v47 = vadd.f32 %v3374_v9, %v1355_v33 }
 0x3eb   : >> { %v1826_v16 = vadd.f32 %v1789_v5, %v1770_v38  ;;  %v1643_v30 = vadd.f32 %v1626_v45, %v1522_v46  ;;  %v1474_v45 = vadd.f32 %v3358_v57, %v1353_v54  ;;  %v1644_v38 = vadd.f32 %v1628_v36, %v1523_v60  ;;  %v1633_v5 = vpop.f32.mrf.mxu3 }
 0x3ec   : >> { %v1524_v57 = vadd.f32 %v3350_v53, %v1397_v34  ;;  %v1475_v42 = vadd.f32 %v3366_v52, %v1354_v6  ;;  %v1754_v53 = vpop.f32.mrf.mxu1  ;;  %v1603_v44 = vadd.f32 %v1590_v27, %v1476_v47 }
 0x3ed   : >> { %2411 = vmatmul.msk.f32.vlgmr.msra.gmra.mxu2 %vm1834_vm8, %v1826_v16  ;;  %2422 = vmatmul.msk.f32.vlgmr.msra.gmra.mxu3 %vm1834_vm8, %v1826_v16  ;;  %v1764_v7 = vadd.f32 %v1747_v50, %v1643_v30  ;;  %v1601_v18 = vadd.f32 %v1585_v37, %v1474_v45  ;;  %v1765_v31 = vadd.f32 %v1749_v20, %v1644_v38 }
 0x3ee   : >> { %v1701_v63 = vpop.f32.mrf.mxu0  ;;  %v1645_v40 = vadd.f32 %v1631_v12, %v1524_v57  ;;  %v1602_v35 = vadd.f32 %v1588_v13, %v1475_v42  ;;  %v1398_v16 = vadd.f32 %v3352_v59, %v3252_v0  ;;  %v1399_v59 = vadd.f32 %v3360_v24, %v3266_v22  ;;  %v3492_v24 = vld [vmem:[#allocation8_spill] sm:$0xff]  ;;  %v3497_v12 = vld [vmem:[#allocation13_spill] sm:$0xff] }
 0x3ef   : >> { %v1720_v43 = vadd.f32 %v1701_v63, %v1599_v3  ;;  %v1809_v63 = vpop.permute.xlu2 %1808 }
 0x3f0   : >> { %v1766_v39 = vadd.f32 %v1752_v32, %v1645_v40  ;;  %v1525_v52 = vadd.f32 %v3356_v11, %v1398_v16  ;;  %v1356_v11 = vadd.f32 %v3362_v17, %v3333_v19  ;;  %v1526_v9 = vadd.f32 %v3364_v1, %v1399_v59  ;;  %v3494_v17 = vld [vmem:[#allocation9_spill] sm:$0xff]  ;;  %v3495_v1 = vld [vmem:[#allocation11_spill] sm:$0xff] }
 0x3f1   : >> { %v1771_v51 = vmax.f32 %v1720_v43, %v1763_v41 }
 0x3f2   : >> { %v1646_v43 = vadd.f32 %v1633_v5, %v1525_v52  ;;  %v1477_v62 = vadd.f32 %v3376_v23, %v1356_v11 }
 0x3f3   : >> { %v1827_v56 = vadd.f32 %v1794_v25, %v1771_v51  ;;  %v1636_v46 = vpop.f32.mrf.mxu3  ;;  %v1814_v25 = vpop.permute.xlu1 %1813 }
 0x3f4   : >> { %v1767_v36 = vadd.f32 %v1754_v53, %v1646_v43  ;;  %v1757_v37 = vpop.f32.mrf.mxu1  ;;  %v1647_v20 = vadd.f32 %v1636_v46, %v1526_v9  ;;  %v1604_v30 = vadd.f32 %v1593_v55, %v1477_v62 }
 0x3f5   : >> { %2412 = vmatmul.msk.f32.gmra.mxu2 %vm1834_vm8, %v1827_v56  ;;  %2423 = vmatmul.msk.f32.gmra.mxu3 %vm1834_vm8, %v1827_v56 }
 0x3f6   : >> { %v1704_v8 = vpop.f32.mrf.mxu0  ;;  %v1768_v21 = vadd.f32 %v1757_v37, %v1647_v20 }
 0x3f7   : >> { %v1721_v10 = vadd.f32 %v1704_v8, %v1600_v14  ;;  %v3493_v14 = vld [vmem:[#allocation10_spill] sm:$0xff] }
 0x3f8   : >> { %v1400_v8 = vadd.f32 %v3493_v14, %v3492_v24 }
 0x3f9   : >> { %v1772_v61 = vmax.f32 %v1721_v10, %v1764_v7  ;;  %v1357_v7 = vadd.f32 %v3495_v1, %v3494_v17  ;;  %v3496_v10 = vld [vmem:[#allocation12_spill] sm:$0xff] }
 0x3fa   : >> { %v1527_v54 = vadd.f32 %v3496_v10, %v1400_v8 }
 0x3fb   : >> { %v1828_v28 = vadd.f32 %v1799_v2, %v1772_v61  ;;  %v1638_v60 = vpop.f32.mrf.mxu3  ;;  %v1595_v61 = vpop.f32.mrf.mxu2  ;;  %v1478_v45 = vadd.f32 %v3497_v12, %v1357_v7 }
 0x3fc   : >> { %v1819_v2 = vpop.permute.xlu2 %1818  ;;  %v1759_v13 = vpop.f32.mrf.mxu1  ;;  %v1648_v38 = vadd.f32 %v1638_v60, %v1527_v54 }
 0x3fd   : >> { %2413 = vmatmul.msk.f32.gmra.mxu2 %vm1834_vm8, %v1828_v28  ;;  %2424 = vmatmul.msk.f32.gmra.mxu3 %vm1834_vm8, %v1828_v28 }
 0x3fe   : >> { %v1706_v50 = vpop.f32.mrf.mxu0 }
 0x3ff   : >> { %v1722_v49 = vadd.f32 %v1706_v50, %v1601_v18  ;;  %v1605_v18 = vadd.f32 %v1595_v61, %v1478_v45  ;;  %v1769_v50 = vadd.f32 %v1759_v13, %v1648_v38 }
 0x401   : >> { %v1773_v58 = vmax.f32 %v1722_v49, %v1765_v31  ;;  %v1824_v49 = vpop.permute.xlu0 %1823 }
 0x403   : >> { %v1829_v48 = vadd.f32 %v1804_v15, %v1773_v58 }
 0x405   : >> { %2414 = vmatmul.msk.f32.gmra.mxu2 %vm1834_vm8, %v1829_v48  ;;  %2425 = vmatmul.msk.f32.gmra.mxu3 %vm1834_vm8, %v1829_v48 }
 0x406   : >> { %v1709_v26 = vpop.f32.mrf.mxu0 }
 0x407   : >> { %v1723_v4 = vadd.f32 %v1709_v26, %v1602_v35 }
 0x409   : >> { %v1774_v3 = vmax.f32 %v1723_v4, %v1766_v39 }
 0x40b   : >> { %v1830_v41 = vadd.f32 %v1809_v63, %v1774_v3 }
 0x40d   : >> { %2415 = vmatmul.msk.f32.gmra.mxu2 %vm1834_vm8, %v1830_v41  ;;  %2426 = vmatmul.msk.f32.gmra.mxu3 %vm1834_vm8, %v1830_v41 }
 0x40e   : >> { %v1711_v0 = vpop.f32.mrf.mxu0 }
 0x40f   : >> { %v1724_v29 = vadd.f32 %v1711_v0, %v1603_v44 }
 0x411   : >> { %v1775_v51 = vmax.f32 %v1724_v29, %v1767_v36 }
 0x413   : >> { %v1831_v56 = vadd.f32 %v1814_v25, %v1775_v51 }
 0x415   : >> { %2416 = vmatmul.msk.f32.gmra.mxu2 %vm1834_vm8, %v1831_v56  ;;  %2427 = vmatmul.msk.f32.gmra.mxu3 %vm1834_vm8, %v1831_v56 }
 0x416   : >> { %v1714_v22 = vpop.f32.mrf.mxu0 }
 0x417   : >> { %v1725_v19 = vadd.f32 %v1714_v22, %v1604_v30 }
 0x419   : >> { %v1776_v23 = vmax.f32 %v1725_v19, %v1768_v21 }
 0x41b   : >> { %v1832_v28 = vadd.f32 %v1819_v2, %v1776_v23 }
 0x41d   : >> { %2417 = vmatmul.msk.f32.gmra.mxu2 %vm1834_vm8, %v1832_v28  ;;  %2428 = vmatmul.msk.f32.gmra.mxu3 %vm1834_vm8, %v1832_v28 }
 0x41e   : >> { %v1716_v32 = vpop.f32.mrf.mxu0 }
 0x41f   : >> { %v1726_v34 = vadd.f32 %v1716_v32, %v1605_v18 }
 0x421   : >> { %v1777_v31 = vmax.f32 %v1726_v34, %v1769_v50 }
 0x423   : >> { %v1833_v6 = vadd.f32 %v1824_v49, %v1777_v31 }
 0x425   : >> { %2418 = vmatmul.msk.f32.gmra.mxu2 %vm1834_vm8, %v1833_v6  ;;  %2429 = vmatmul.msk.f32.gmra.mxu3 %vm1834_vm8, %v1833_v6 }
 0x470   : >> { %v1876_v57 = vpop.f32.mrf.mxu2  ;;  %v1917_v58 = vpop.f32.mrf.mxu3 }
 0x471   : >> { %v1941_v15 = vmax.f32 %v1876_v57, %v1917_v58 }
 0x473   : >> { %v1949_v42 = vpack.c.bf16 %v1941_v15, %v1941_v15 }
 0x475   : >> { %1961 = vst.msk [vmem:[%s3436_s11] sm:$0xf] %vm1960_vm9, %v1949_v42 }
 0x478   : >> { %v1879_v48 = vpop.f32.mrf.mxu2  ;;  %v1920_v40 = vpop.f32.mrf.mxu3 }
 0x479   : >> { %v1942_v5 = vmax.f32 %v1879_v48, %v1920_v40 }
 0x47b   : >> { %v1950_v35 = vpack.c.bf16 %v1942_v5, %v1942_v5 }
 0x47d   : >> { %1962 = vst.msk [vmem:[%s3436_s11 + $0x4] sm:$0xf] %vm1960_vm9, %v1950_v35 }
 0x480   : >> { %v1882_v27 = vpop.f32.mrf.mxu2  ;;  %v1923_v26 = vpop.f32.mrf.mxu3 }
 0x481   : >> { %v1943_v16 = vmax.f32 %v1882_v27, %v1923_v26 }
 0x483   : >> { %v1951_v39 = vpack.c.bf16 %v1943_v16, %v1943_v16 }
 0x485   : >> { %1963 = vst.msk [vmem:[%s3436_s11 + $0x8] sm:$0xf] %vm1960_vm9, %v1951_v39 }
 0x488   : >> { %v1885_v4 = vpop.f32.mrf.mxu2  ;;  %v1926_v53 = vpop.f32.mrf.mxu3 }
 0x489   : >> { %v1944_v33 = vmax.f32 %v1885_v4, %v1926_v53 }
 0x48b   : >> { %v1952_v52 = vpack.c.bf16 %v1944_v33, %v1944_v33 }
 0x48d   : >> { %1964 = vst.msk [vmem:[%s3436_s11 + $0xc] sm:$0xf] %vm1960_vm9, %v1952_v52 }
 0x490   : >> { %v1888_v3 = vpop.f32.mrf.mxu2  ;;  %v1929_v63 = vpop.f32.mrf.mxu3 }
 0x491   : >> { %v1945_v47 = vmax.f32 %v1888_v3, %v1929_v63 }
 0x493   : >> { %v1953_v41 = vpack.c.bf16 %v1945_v47, %v1945_v47 }
 0x495   : >> { %1965 = vst.msk [vmem:[%s3436_s11 + $0x10] sm:$0xf] %vm1960_vm9, %v1953_v41 }
 0x498   : >> { %v1891_v43 = vpop.f32.mrf.mxu2  ;;  %v1932_v44 = vpop.f32.mrf.mxu3 }
 0x499   : >> { %v1946_v0 = vmax.f32 %v1891_v43, %v1932_v44 }
 0x49b   : >> { %v1954_v59 = vpack.c.bf16 %v1946_v0, %v1946_v0 }
 0x49d   : >> { %1966 = vst.msk [vmem:[%s3436_s11 + $0x14] sm:$0xf] %vm1960_vm9, %v1954_v59 }
 0x4a0   : >> { %v1894_v46 = vpop.f32.mrf.mxu2  ;;  %v1935_v36 = vpop.f32.mrf.mxu3 }
 0x4a1   : >> { %v1947_v29 = vmax.f32 %v1894_v46, %v1935_v36 }
 0x4a3   : >> { %v1955_v55 = vpack.c.bf16 %v1947_v29, %v1947_v29 }
 0x4a5   : >> { %1967 = vst.msk [vmem:[%s3436_s11 + $0x18] sm:$0xf] %vm1960_vm9, %v1955_v55 }
 0x4a8   : >> { %v1897_v11 = vpop.f32.mrf.mxu2  ;;  %v1938_v9 = vpop.f32.mrf.mxu3 }
 0x4a9   : >> { %v1948_v51 = vmax.f32 %v1897_v11, %v1938_v9  ;;  %637 = sbr.rel (!%p635_p5) target bundleno = 484 (0x1e4), region = 112 }
 0x4ab   : >> { %v1956_v37 = vpack.c.bf16 %v1948_v51, %v1948_v51 }
 0x4ad   : >> { %1968 = vst.msk [vmem:[%s3436_s11 + $0x1c] sm:$0xf] %vm1960_vm9, %v1956_v37 }
 0x4ae PF: > { %s15_s18 = sadd.s32 1, %s2574_s18  }
 0x4af   : > { %p12_p6 = scmp.ge.s32.totalorder %s15_s18, 4  }
 0x4b1   :  { %14 = sbr.rel (!%p12_p6) target bundleno = 1 (0x1), region = 123 }

</bundles_post_ra>
